<compile_context>
chip_gen: v7x
topology: tpu7x:2x2x1
jax: 0.10.0
libtpu: 0.0.40
codegen_flags: <defaults>
</compile_context>

<pallas_src>
import functools

import jax
import jax.numpy as jnp
from jax.experimental import pallas as pl
from jax.experimental.pallas import tpu as pltpu


def _ffn_kernel(x_ref, halo_ref, w1_ref, b1_ref, w2_ref, b2_ref, g_ref,
                beta_ref, o_ref, *, seq_len, block_t, p1, eps, ragged):
    # x block: (1, block_t, d_in) tile of the input sequence.
    x = x_ref[0].astype(jnp.float32)                       # (block_t, d_in)

    if ragged:
        # The last tile may read past seq_len: zero the garbage rows so the
        # conv taps of the final valid row see the correct zero padding.
        # Stores of those rows land out of bounds and are dropped by Pallas.
        num_valid = seq_len - pl.program_id(1) * block_t
        row = jax.lax.broadcasted_iota(jnp.int32, (block_t, 1), 0)
        x = jnp.where(row < num_valid, x, 0.0)

    # ---- Conv1d #1: rebuild the k1 taps from shifted views + halo rows ----
    if p1 > 0:
        halo = halo_ref[0, 0].astype(jnp.float32)          # (2*p1, d_in)
        prev_rows, next_rows = halo[:p1], halo[p1:]
        taps = []
        for d in range(-p1, p1 + 1):                       # static Python loop
            if d < 0:
                taps.append(jnp.concatenate(
                    [prev_rows[p1 + d:], x[:block_t + d]], axis=0))
            elif d == 0:
                taps.append(x)
            else:
                taps.append(jnp.concatenate(
                    [x[d:], next_rows[:d]], axis=0))
        xcat = jnp.concatenate(taps, axis=1)               # (block_t, k1*d_in)
    else:
        xcat = x

    # One MXU matmul over the fused contraction (bf16 operands, f32 acc).
    h = jnp.dot(xcat.astype(jnp.bfloat16), w1_ref[...],
                preferred_element_type=jnp.float32)        # (block_t, d_hid)
    h = jnp.maximum(h + b1_ref[...], 0.0)                  # bias + ReLU in f32

    # ---- Conv1d #2: pointwise (kernel 1, pad 0) ----
    y = jnp.dot(h.astype(jnp.bfloat16), w2_ref[...],
                preferred_element_type=jnp.float32) + b2_ref[...]

    # TODO(synk): dropout is identity here (inference mode); no RNG mask applied.

    # ---- residual + LayerNorm (two-pass statistics, f32 epilogue) ----
    y = y + x
    d_in = y.shape[-1]
    mean = jnp.sum(y, axis=-1, keepdims=True) * (1.0 / d_in)
    centered = y - mean
    var = jnp.sum(centered * centered, axis=-1, keepdims=True) * (1.0 / d_in)
    normed = centered * jax.lax.rsqrt(var + eps)
    o_ref[0] = (normed * g_ref[...] + beta_ref[...]).astype(o_ref.dtype)


def positionwise_ffn(x, w1, b1, w2, b2, gamma, beta,
                     fft_conv1d_kernel=(3, 1), fft_conv1d_padding=(1, 0),
                     eps=1e-5, block_t=512):
    """x: (B, T, d_in); w1: (K1, d_in, d_hid); w2: (K2, d_hid, d_in)."""
    B, T, d_in = x.shape
    k1, k2 = fft_conv1d_kernel
    p1, p2 = fft_conv1d_padding
    d_hid = w1.shape[2]

    # Residual add in the PyTorch module requires a length-preserving conv #1,
    # and the standard FastSpeech2 configs use a pointwise conv #2.
    assert 2 * p1 == k1 - 1, "conv1 must preserve sequence length"
    assert k2 == 1 and p2 == 0, "second conv must be pointwise"
    assert 0 <= p1 < 8, "halo width must fit inside one 8-row tile"
    # TODO(synk): general k2 > 1 would need a halo on conv #2; not supported.

    # ---- time tile: multiple of 8, as large as fits, >=2 grid steps if B==1 ----
    t_ceil8 = ((T + 7) // 8) * 8
    block_t = max(8, (min(block_t, t_ceil8) // 8) * 8)
    if B == 1 and T > 8:
        half = (((T + 1) // 2 + 7) // 8) * 8   # keep both TensorCores busy (v7x)
        block_t = min(block_t, half)
    n_t = pl.cdiv(T, block_t)
    ragged = (T % block_t) != 0

    # ---- tiny per-tile halo rows (p1 before / p1 after each tile) ----
    halo_rows = max(2 * p1, 1)
    if p1 > 0:
        starts = jnp.arange(n_t, dtype=jnp.int32) * block_t
        prev_idx = starts[:, None] - jnp.arange(p1, 0, -1, dtype=jnp.int32)[None, :]
        next_idx = starts[:, None] + block_t + jnp.arange(p1, dtype=jnp.int32)[None, :]
        halo_idx = jnp.concatenate([prev_idx, next_idx], axis=1)     # (n_t, 2*p1)
        in_range = (halo_idx >= 0) & (halo_idx < T)
        gathered = x[:, jnp.clip(halo_idx, 0, T - 1), :]             # small gather
        halo = jnp.where(in_range[None, :, :, None], gathered, 0.0).astype(jnp.float32)
    else:
        halo = jnp.zeros((B, n_t, halo_rows, d_in), jnp.float32)

    # ---- fuse / cast weights (bf16 MXU operands, f32 bias/affine) ----
    kd = k1 * d_in
    w1_fused = w1.reshape(kd, d_hid).astype(jnp.bfloat16)            # taps stacked
    w2_mat = w2[0].astype(jnp.bfloat16)                              # (d_hid, d_in)
    b1_2d = b1.reshape(1, d_hid).astype(jnp.float32)
    b2_2d = b2.reshape(1, d_in).astype(jnp.float32)
    g_2d = gamma.reshape(1, d_in).astype(jnp.float32)
    beta_2d = beta.reshape(1, d_in).astype(jnp.float32)

    kernel = functools.partial(_ffn_kernel, seq_len=T, block_t=block_t,
                               p1=p1, eps=eps, ragged=ragged)
    full = lambda shape: pl.BlockSpec(shape, lambda b, t: (0,) * len(shape))

    x_map = lambda b, t: (b, t, 0)
    x_spec = pl.BlockSpec((1, block_t, d_in), x_map)
    if B * n_t >= 3:
        try:    # deeper buffering on the streamed activation input
            x_spec = pl.BlockSpec((1, block_t, d_in), x_map,
                                  pipeline_mode=pl.Buffered(3))
        except Exception:          # pragma: no cover - older jax w/o pipeline_mode
            x_spec = pl.BlockSpec((1, block_t, d_in), x_map)

    out = pl.pallas_call(
        kernel,
        out_shape=jax.ShapeDtypeStruct((B, T, d_in), x.dtype),
        grid_spec=pltpu.PrefetchScalarGridSpec(
            num_scalar_prefetch=0,
            grid=(B, n_t),
            in_specs=[
                x_spec,                                                      # x
                pl.BlockSpec((1, 1, halo_rows, d_in), lambda b, t: (b, t, 0, 0)),
                full((kd, d_hid)),                                           # w1
                full((1, d_hid)),                                            # b1
                full((d_hid, d_in)),                                         # w2
                full((1, d_in)),                                             # b2
                full((1, d_in)),                                             # gamma
                full((1, d_in)),                                             # beta
            ],
            out_specs=pl.BlockSpec((1, block_t, d_in), lambda b, t: (b, t, 0)),
        ),
        compiler_params=pltpu.CompilerParams(
            dimension_semantics=("parallel", "parallel"),
            vmem_limit_bytes=32 * 1024 * 1024,
        ),
    )(x, halo, w1_fused, b1_2d, w2_mat, b2_2d, g_2d, beta_2d)
    return out


def reference_ffn(x, w1, b1, w2, b2, gamma, beta, kernels, pads,
                  eps=1e-5, mxu_bf16=False):
    """Pure-JAX reference (channels-last, weights as (K, C_in, C_out))."""
    (k1, k2), (p1, p2) = kernels, pads
    B, T, d_in = x.shape
    xf = x.astype(jnp.float32)

    def rnd(v):
        return v.astype(jnp.bfloat16).astype(jnp.float32) if mxu_bf16 else v

    def conv(inp, w, bias, k, p):
        padded = jnp.pad(inp, ((0, 0), (p, p), (0, 0)))
        acc = jnp.zeros((B, inp.shape[1], w.shape[2]), jnp.float32)
        for kk in range(k):
            acc = acc + jnp.einsum("bti,io->bto",
                                   rnd(padded[:, kk:kk + inp.shape[1], :]),
                                   rnd(w[kk].astype(jnp.float32)))
        return acc + bias

    h = jax.nn.relu(conv(xf, w1, b1, k1, p1))
    y = conv(h, w2, b2, k2, p2) + xf
    mean = jnp.mean(y, -1, keepdims=True)
    var = jnp.mean((y - mean) ** 2, -1, keepdims=True)
    return ((y - mean) * jax.lax.rsqrt(var + eps)) * gamma + beta


if __name__ == "__main__":
    # Small but lane-dense shapes consistent with a FastSpeech2 FFT block.
    B, T, d_in, d_hid = 2, 96, 128, 256
    fft_conv1d_kernel = (3, 1)
    fft_conv1d_padding = (1, 0)

    key = jax.random.PRNGKey(0)
    kx, kw1, kb1, kw2, kb2, kg, kbt = jax.random.split(key, 7)

    x = jax.random.normal(kx, (B, T, d_in), jnp.float32)
    # Deterministic synthetic parameters (not a checkpoint load).
    w1 = jax.random.normal(kw1, (fft_conv1d_kernel[0], d_in, d_hid), jnp.float32) * 0.05
    b1 = jax.random.normal(kb1, (d_hid,), jnp.float32) * 0.1
    w2 = jax.random.normal(kw2, (fft_conv1d_kernel[1], d_hid, d_in), jnp.float32) * 0.05
    b2 = jax.random.normal(kb2, (d_in,), jnp.float32) * 0.1
    gamma = 1.0 + 0.1 * jax.random.normal(kg, (d_in,), jnp.float32)
    beta = 0.1 * jax.random.normal(kbt, (d_in,), jnp.float32)

    ref_bf16 = reference_ffn(x, w1, b1, w2, b2, gamma, beta,
                             fft_conv1d_kernel, fft_conv1d_padding, mxu_bf16=True)
    ref_f32 = reference_ffn(x, w1, b1, w2, b2, gamma, beta,
                            fft_conv1d_kernel, fft_conv1d_padding, mxu_bf16=False)

    # (a) single tile per sequence: halo rows are exactly the conv zero padding.
    out_a = jax.block_until_ready(positionwise_ffn(
        x, w1, b1, w2, b2, gamma, beta, fft_conv1d_kernel, fft_conv1d_padding))
    # (b) multiple tiles with non-zero cross-tile halos, T % block_t == 0.
    out_b = jax.block_until_ready(positionwise_ffn(
        x, w1, b1, w2, b2, gamma, beta, fft_conv1d_kernel, fft_conv1d_padding,
        block_t=48))
    # (c) ragged last tile (T % block_t != 0): in-kernel row mask plus dropped
    #     out-of-bounds stores instead of wrapper pad/trim copies.
    out_c = jax.block_until_ready(positionwise_ffn(
        x, w1, b1, w2, b2, gamma, beta, fft_conv1d_kernel, fft_conv1d_padding,
        block_t=64))

    for out in (out_a, out_b, out_c):
        assert out.shape == (B, T, d_in)
        # Tight check vs a reference that rounds the matmul operands to bf16
        # exactly like the kernel does (accumulation in f32 in both).
        assert jnp.allclose(out, ref_bf16, atol=5e-3, rtol=5e-3), \
            "mismatch vs bf16-operand reference"
    # Loose check vs the pure-f32 PyTorch-equivalent math.
    assert jnp.allclose(out_a, ref_f32, atol=5e-2, rtol=5e-2), \
        "mismatch vs f32 reference"

    print("KERNEL_OK")
</pallas_src>

<mosaic_0001>
module attributes {stable_mosaic.version = 11 : i64} {
  func.func @_ffn_kernel(%arg0: i32, %arg1: i32, %arg2: memref<1x96x128xf32, #tpu.memory_space<vmem>>, %arg3: memref<1x1x2x128xf32, #tpu.memory_space<vmem>>, %arg4: memref<384x256xbf16, #tpu.memory_space<vmem>>, %arg5: memref<1x256xf32, #tpu.memory_space<vmem>>, %arg6: memref<256x128xbf16, #tpu.memory_space<vmem>>, %arg7: memref<1x128xf32, #tpu.memory_space<vmem>>, %arg8: memref<1x128xf32, #tpu.memory_space<vmem>>, %arg9: memref<1x128xf32, #tpu.memory_space<vmem>>, %arg10: memref<1x96x128xf32, #tpu.memory_space<vmem>>) attributes {dimension_semantics = [#tpu.dimension_semantics<parallel>, #tpu.dimension_semantics<parallel>], iteration_bounds = array<i64: 2, 1>, scalar_prefetch = 0 : i64, scratch_operands = 0 : i64, tpu.core_type = #tpu.core_type<tc>, window_params = [{transform_indices = @transform_0, window_bounds = array<i64: 1, 96, 128>}, {transform_indices = @transform_1, window_bounds = array<i64: 1, 1, 2, 128>}, {pipeline_mode = #tpu.pipeline_mode<synchronous>, transform_indices = @transform_2, window_bounds = array<i64: 384, 256>}, {pipeline_mode = #tpu.pipeline_mode<synchronous>, transform_indices = @transform_3, window_bounds = array<i64: 1, 256>}, {pipeline_mode = #tpu.pipeline_mode<synchronous>, transform_indices = @transform_4, window_bounds = array<i64: 256, 128>}, {pipeline_mode = #tpu.pipeline_mode<synchronous>, transform_indices = @transform_5, window_bounds = array<i64: 1, 128>}, {pipeline_mode = #tpu.pipeline_mode<synchronous>, transform_indices = @transform_6, window_bounds = array<i64: 1, 128>}, {pipeline_mode = #tpu.pipeline_mode<synchronous>, transform_indices = @transform_7, window_bounds = array<i64: 1, 128>}, {transform_indices = @transform_8, window_bounds = array<i64: 1, 96, 128>}]} {
    %c0 = arith.constant 0 : index
    %c0_0 = arith.constant 0 : index
    %c0_1 = arith.constant 0 : index
    %0 = vector.load %arg2[%c0, %c0_0, %c0_1] : memref<1x96x128xf32, #tpu.memory_space<vmem>>, vector<1x96x128xf32>
    %1 = vector.shape_cast %0 : vector<1x96x128xf32> to vector<96x128xf32>
    %c0_2 = arith.constant 0 : index
    %c0_3 = arith.constant 0 : index
    %c0_4 = arith.constant 0 : index
    %c0_5 = arith.constant 0 : index
    %2 = vector.load %arg3[%c0_2, %c0_3, %c0_4, %c0_5] : memref<1x1x2x128xf32, #tpu.memory_space<vmem>>, vector<1x1x2x128xf32>
    %3 = vector.shape_cast %2 : vector<1x1x2x128xf32> to vector<2x128xf32>
    %4 = vector.extract_strided_slice %3 {offsets = [0, 0], sizes = [1, 128], strides = [1, 1]} : vector<2x128xf32> to vector<1x128xf32>
    %5 = vector.extract_strided_slice %3 {offsets = [1, 0], sizes = [1, 128], strides = [1, 1]} : vector<2x128xf32> to vector<1x128xf32>
    %6 = vector.extract_strided_slice %1 {offsets = [0, 0], sizes = [95, 128], strides = [1, 1]} : vector<96x128xf32> to vector<95x128xf32>
    %7 = tpu.concatenate %4, %6 in 0 : vector<1x128xf32>, vector<95x128xf32> -> vector<96x128xf32>
    %8 = vector.extract_strided_slice %1 {offsets = [1, 0], sizes = [95, 128], strides = [1, 1]} : vector<96x128xf32> to vector<95x128xf32>
    %9 = tpu.concatenate %8, %5 in 0 : vector<95x128xf32>, vector<1x128xf32> -> vector<96x128xf32>
    %10 = tpu.concatenate %7, %1, %9 in 1 : vector<96x128xf32>, vector<96x128xf32>, vector<96x128xf32> -> vector<96x384xf32>
    %11 = arith.truncf %10 : vector<96x384xf32> to vector<96x384xbf16>
    %c0_6 = arith.constant 0 : index
    %c0_7 = arith.constant 0 : index
    %12 = vector.load %arg4[%c0_6, %c0_7] : memref<384x256xbf16, #tpu.memory_space<vmem>>, vector<384x256xbf16>
    %cst = arith.constant dense<0.000000e+00> : vector<96x256xf32>
    %13 = tpu.matmul %11, %12, %cst {dimension_numbers = #tpu.dot_dimension_numbers<[1], [0], [0], [1], [0, 0, 1, 1], [], []>} : vector<96x384xbf16>, vector<384x256xbf16>, vector<96x256xf32> -> vector<96x256xf32>
    %c0_8 = arith.constant 0 : index
    %c0_9 = arith.constant 0 : index
    %14 = vector.load %arg5[%c0_8, %c0_9] : memref<1x256xf32, #tpu.memory_space<vmem>>, vector<1x256xf32>
    %15 = vector.broadcast %14 : vector<1x256xf32> to vector<96x256xf32>
    %16 = arith.addf %13, %15 : vector<96x256xf32>
    %cst_10 = arith.constant 0.000000e+00 : f32
    %17 = vector.broadcast %cst_10 : f32 to vector<96x256xf32>
    %18 = arith.maximumf %16, %17 : vector<96x256xf32>
    %19 = arith.truncf %18 : vector<96x256xf32> to vector<96x256xbf16>
    %c0_11 = arith.constant 0 : index
    %c0_12 = arith.constant 0 : index
    %20 = vector.load %arg6[%c0_11, %c0_12] : memref<256x128xbf16, #tpu.memory_space<vmem>>, vector<256x128xbf16>
    %cst_13 = arith.constant dense<0.000000e+00> : vector<96x128xf32>
    %21 = tpu.matmul %19, %20, %cst_13 {dimension_numbers = #tpu.dot_dimension_numbers<[1], [0], [0], [1], [0, 0, 1, 1], [], []>} : vector<96x256xbf16>, vector<256x128xbf16>, vector<96x128xf32> -> vector<96x128xf32>
    %c0_14 = arith.constant 0 : index
    %c0_15 = arith.constant 0 : index
    %22 = vector.load %arg7[%c0_14, %c0_15] : memref<1x128xf32, #tpu.memory_space<vmem>>, vector<1x128xf32>
    %23 = vector.broadcast %22 : vector<1x128xf32> to vector<96x128xf32>
    %24 = arith.addf %21, %23 : vector<96x128xf32>
    %25 = arith.addf %24, %1 : vector<96x128xf32>
    %cst_16 = arith.constant dense<0.000000e+00> : vector<96xf32>
    %26 = vector.multi_reduction <add>, %25, %cst_16 [1] : vector<96x128xf32> to vector<96xf32>
    %27 = vector.shape_cast %26 : vector<96xf32> to vector<96x1xf32>
    %cst_17 = arith.constant 7.812500e-03 : f32
    %28 = vector.broadcast %cst_17 : f32 to vector<96x1xf32>
    %29 = arith.mulf %27, %28 : vector<96x1xf32>
    %30 = vector.broadcast %29 : vector<96x1xf32> to vector<96x128xf32>
    %31 = arith.subf %25, %30 : vector<96x128xf32>
    %32 = arith.mulf %31, %31 : vector<96x128xf32>
    %cst_18 = arith.constant dense<0.000000e+00> : vector<96xf32>
    %33 = vector.multi_reduction <add>, %32, %cst_18 [1] : vector<96x128xf32> to vector<96xf32>
    %34 = vector.shape_cast %33 : vector<96xf32> to vector<96x1xf32>
    %cst_19 = arith.constant 7.812500e-03 : f32
    %35 = vector.broadcast %cst_19 : f32 to vector<96x1xf32>
    %36 = arith.mulf %34, %35 : vector<96x1xf32>
    %cst_20 = arith.constant 9.99999974E-6 : f32
    %37 = vector.broadcast %cst_20 : f32 to vector<96x1xf32>
    %38 = arith.addf %36, %37 : vector<96x1xf32>
    %39 = math.rsqrt %38 : vector<96x1xf32>
    %40 = vector.broadcast %39 : vector<96x1xf32> to vector<96x128xf32>
    %41 = arith.mulf %31, %40 : vector<96x128xf32>
    %c0_21 = arith.constant 0 : index
    %c0_22 = arith.constant 0 : index
    %42 = vector.load %arg8[%c0_21, %c0_22] : memref<1x128xf32, #tpu.memory_space<vmem>>, vector<1x128xf32>
    %43 = vector.broadcast %42 : vector<1x128xf32> to vector<96x128xf32>
    %44 = arith.mulf %41, %43 : vector<96x128xf32>
    %c0_23 = arith.constant 0 : index
    %c0_24 = arith.constant 0 : index
    %45 = vector.load %arg9[%c0_23, %c0_24] : memref<1x128xf32, #tpu.memory_space<vmem>>, vector<1x128xf32>
    %46 = vector.broadcast %45 : vector<1x128xf32> to vector<96x128xf32>
    %47 = arith.addf %44, %46 : vector<96x128xf32>
    %c0_25 = arith.constant 0 : index
    %c0_26 = arith.constant 0 : index
    %c0_27 = arith.constant 0 : index
    %48 = vector.load %arg10[%c0_25, %c0_26, %c0_27] : memref<1x96x128xf32, #tpu.memory_space<vmem>>, vector<1x96x128xf32>
    %49 = vector.shape_cast %48 : vector<1x96x128xf32> to vector<96x128xf32>
    %50 = vector.shape_cast %47 : vector<96x128xf32> to vector<1x96x128xf32>
    tpu.vector_store %arg10[%c0_25, %c0_26, %c0_27], %50 {strides = array<i32>} : memref<1x96x128xf32, #tpu.memory_space<vmem>>, vector<1x96x128xf32>,
    return
  }
  func.func @transform_0(%arg0: i32, %arg1: i32) -> (i32, i32, i32) {
    %c0_i32 = arith.constant 0 : i32
    %c0_i32_0 = arith.constant 0 : i32
    return %arg0, %arg1, %c0_i32 : i32, i32, i32
  }
  func.func @transform_1(%arg0: i32, %arg1: i32) -> (i32, i32, i32, i32) {
    %c0_i32 = arith.constant 0 : i32
    %c0_i32_0 = arith.constant 0 : i32
    %c0_i32_1 = arith.constant 0 : i32
    return %arg0, %arg1, %c0_i32, %c0_i32_0 : i32, i32, i32, i32
  }
  func.func @transform_2(%arg0: i32, %arg1: i32) -> (i32, i32) {
    %c0_i32 = arith.constant 0 : i32
    %c0_i32_0 = arith.constant 0 : i32
    %c0_i32_1 = arith.constant 0 : i32
    return %c0_i32, %c0_i32_0 : i32, i32
  }
  func.func @transform_3(%arg0: i32, %arg1: i32) -> (i32, i32) {
    %c0_i32 = arith.constant 0 : i32
    %c0_i32_0 = arith.constant 0 : i32
    %c0_i32_1 = arith.constant 0 : i32
    return %c0_i32, %c0_i32_0 : i32, i32
  }
  func.func @transform_4(%arg0: i32, %arg1: i32) -> (i32, i32) {
    %c0_i32 = arith.constant 0 : i32
    %c0_i32_0 = arith.constant 0 : i32
    %c0_i32_1 = arith.constant 0 : i32
    return %c0_i32, %c0_i32_0 : i32, i32
  }
  func.func @transform_5(%arg0: i32, %arg1: i32) -> (i32, i32) {
    %c0_i32 = arith.constant 0 : i32
    %c0_i32_0 = arith.constant 0 : i32
    %c0_i32_1 = arith.constant 0 : i32
    return %c0_i32, %c0_i32_0 : i32, i32
  }
  func.func @transform_6(%arg0: i32, %arg1: i32) -> (i32, i32) {
    %c0_i32 = arith.constant 0 : i32
    %c0_i32_0 = arith.constant 0 : i32
    %c0_i32_1 = arith.constant 0 : i32
    return %c0_i32, %c0_i32_0 : i32, i32
  }
  func.func @transform_7(%arg0: i32, %arg1: i32) -> (i32, i32) {
    %c0_i32 = arith.constant 0 : i32
    %c0_i32_0 = arith.constant 0 : i32
    %c0_i32_1 = arith.constant 0 : i32
    return %c0_i32, %c0_i32_0 : i32, i32
  }
  func.func @transform_8(%arg0: i32, %arg1: i32) -> (i32, i32, i32) {
    %c0_i32 = arith.constant 0 : i32
    %c0_i32_0 = arith.constant 0 : i32
    return %arg0, %arg1, %c0_i32 : i32, i32, i32
  }
}

</mosaic_0001>

<bundles_post_ra>
// kernel: tpu_custom_call.1
= control target key start
LH: loop header
LB: loop body
LE: loop exit
PB: predicated region body
PF: predicated region fallthrough
CT: control target
= control target key end

     0   :  { %s2984_s0 = inlined_call_operand.hbm [shape: f32[2,96,128], index: 0, kind: input, shape index: {}]   ;;  %s2985_s1 = inlined_call_operand.hbm [shape: f32[2,1,2,128], index: 1, kind: input, shape index: {}]   ;;  %s2986_s2 = inlined_call_operand.hbm [shape: bf16[384,256], index: 2, kind: input, shape index: {}]   ;;  %s2987_s3 = inlined_call_operand.vmem [shape: f32[1,256], index: 3, kind: input, shape index: {}]   ;;  %s2988_s4 = inlined_call_operand.hbm [shape: bf16[256,128], index: 4, kind: input, shape index: {}]   ;;  %s2989_s5 = inlined_call_operand.vmem [shape: f32[1,128], index: 5, kind: input, shape index: {}]   ;;  %s2990_s6 = inlined_call_operand.vmem [shape: f32[1,128], index: 6, kind: input, shape index: {}]   ;;  %s2991_s7 = inlined_call_operand.vmem [shape: f32[1,128], index: 7, kind: input, shape index: {}]   ;;  %s2992_s8 = inlined_call_operand.hbm [shape: f32[2,96,128], index: 8, kind: output, shape index: {}]  }
   0x1   :  { %3003 = sst [smem:[#allocation21_spill]] %s2984_s0 }
   0x2   :  { %3004 = sst [smem:[#allocation22_spill]] %s2986_s2 }
   0x3   :  { %3005 = sst [smem:[#allocation23_spill]] %s2988_s4 }
   0x4   :  { %13 = vsyncpa [#allocation3], 0 }
   0x5   :  { %15 = vsyncpa [#allocation3 + $0x1], 0 }
   0x6   :  { %16 = vsyncpa [#allocation6], 0 }
   0x7   :  { %18 = vsyncpa [#allocation6 + $0x1], 0 }
   0x8   :  { %19 = vsyncpa [#allocation9], 0 }
   0x9   :  { %20 = vsyncpa [#allocation4], 0 }
   0xa   :  { %22 = vsyncpa [#allocation4 + $0x1], 0  ;;  %s2291_s27 = smov 0   ;;  %s2293_s28 = smov 0  }
   0xb   :  { %s2295_s29 = smov 0   ;;  %s2297_s30 = smov 0  }
   0xc   :  { %s2299_s9 = smov 0   ;;  %s2301_s10 = smov 0  }
   0xd LB: > { %3006 = sst [smem:[#allocation16_spill]] %s2212_s27  ;;  %s2322_s11 = sadd.s32 4294967295, %s2232_s10   ;;  %s2232_s10 = sphi %s2301_s10, %s28_s10   ;;  %s2228_s9 = sphi %s2299_s9, %s3040_s9   ;;  %s2224_s30 = sphi %s2297_s30, %s3039_s30   ;;  %s2220_s29 = sphi %s2295_s29, %s3035_s29   ;;  %s2216_s28 = sphi %s2293_s28, %s3038_s28   ;;  %s2212_s27 = sphi %s2291_s27, %s3037_s27  }
   0xe   : > { %3007 = sst [smem:[#allocation17_spill]] %s2220_s29  ;;  %s1613_s12 = sadd.s32 4294967294, %s2232_s10  }
   0xf   : > { %p62_p0 = scmp.ne.s32.totalorder %s2216_s28, %s2212_s27  ;;  %p2993_p1 = scmp.eq.s32.totalorder %s2322_s11, 0 }
  0x10   : > { %p248_p3 = scmp.eq.s32.totalorder %s1613_s12, 1  ;;  %p1614_p5 = scmp.ge.s32.totalorder %s2232_s10, 1 }
  0x11   : > { %p2331_p4 = por %p2993_p1, %p62_p0  ;;  %p255_p7 = scmp.lt.s32.totalorder %s2232_s10, 3 }
  0x12   : > { %p2336_p6 = por %p248_p3, %p62_p0  ;;  %s2234_s16 = smov [#allocation7]  }
  0x13   : > { %s3008_s13 = scalar_select %p2331_p4, 1, 0 }
  0x14   : > { %s3009_s14 = scalar_select %p2336_p6, 1, 0 }
  0x15   : > { %p2341_p8 = pnand %p1614_p5, %p255_p7  ;;  %s267_s17 = sshll.u32 %s2234_s16, 4  ;;  %s2345_s17 = int_to_ptr.vmem [resolvable:$true] %s267_s17 }
  0x16   : > { %3010 = sst [smem:[#allocation18_spill]] %s3009_s14  ;;  %s2235_s19 = smov [#allocation8]  }
  0x17   : > { %s3011_s15 = scalar_select %p2341_p8, 1, 0 }
  0x18   : > { %p1829_p9 = pneg %p2341_p8  ;;  %s283_s20 = sshll.u32 %s2235_s19, 4  ;;  %s2356_s20 = int_to_ptr.vmem [resolvable:$true] %s283_s20 }
  0x19   : > { %s3013_s2 = sld [smem:[#allocation22_spill]] }
  0x1a   : > { %p2352_p11 = pnand %p1829_p9, %p2993_p1 }
  0x1c   : > { %p2024_p13 = pneg %p2352_p11 }
  0x1f   : > { %s2022_s23 = scalar_lea.hbm %s3013_s2, 6144 }
  0x20   : > { %p2023_p12 = scmp.ne.s32.totalorder %s3013_s2, %s2022_s23  ;;  %p2029_p5 = scmp.lt.u32.totalorder %s2022_s23, %s3013_s2 }
  0x22   : > { %p2025_p0 = pnand %p2024_p13, %p2023_p12 }
  0x24   : > { %p2026_p3 = pneg %p2025_p0 }
  0x26   : > { %p2031_p7 = pnand %p2029_p5, %p2026_p3 }
  0x28   : > { %2034 = shalt.err (!%p2031_p7)
}
  0x29   : > { %s2035_s16 = scalar_lea.vmem %s2345_s17, 6144  ;;  %p2043_p2 = scmp.lt.s32.totalorder %s2345_s17, %s2345_s17 }
  0x2a   : > { %p2036_p9 = scmp.ne.s32.totalorder %s2345_s17, %s2035_s16  ;;  %p2044_p12 = scmp.lt.s32.totalorder %s2035_s16, %s2035_s16 }
  0x2c   : > { %p2038_p10 = pnand %p2036_p9, %p2024_p13  ;;  %p2045_p0 = por %p2044_p12, %p2043_p2 }
  0x2e   : > { %p2039_p1 = pneg %p2038_p10 }
  0x30   : > { %p2046_p6 = pnand %p2045_p0, %p2039_p1 }
  0x32   : > { %2049 = shalt.err (!%p2046_p6)
}
  0x33   : > { %s2996_s19 = smov 128   ;;  %s2997_s21 = smov 8  }
  0x34   : > { %1832 = dma.hbm_to_vmem [thread:$0]  (!%p2352_p11), %s3013_s2, 6144, %s2345_s17, [#allocation6], %s2996_s19, %s2996_s19, %s2997_s21  }
  0x35   : > { %s3014_s4 = sld [smem:[#allocation23_spill]] }
  0x3b   : > { %s2050_s26 = scalar_lea.hbm %s3014_s4, 2048 }
  0x3c   : > { %p2051_p1 = scmp.ne.s32.totalorder %s3014_s4, %s2050_s26  ;;  %p2057_p10 = scmp.lt.u32.totalorder %s2050_s26, %s3014_s4 }
  0x3e   : > { %p2053_p2 = pnand %p2051_p1, %p2024_p13 }
  0x40   : > { %p2054_p6 = pneg %p2053_p2 }
  0x42   : > { %p2059_p3 = pnand %p2057_p10, %p2054_p6 }
  0x44   : > { %2062 = shalt.err (!%p2059_p3)
}
  0x45   : > { %s2063_s17 = scalar_lea.vmem %s2356_s20, 2048  ;;  %p2071_p12 = scmp.lt.s32.totalorder %s2356_s20, %s2356_s20 }
  0x46   : > { %p2064_p5 = scmp.ne.s32.totalorder %s2356_s20, %s2063_s17  ;;  %p2072_p0 = scmp.lt.s32.totalorder %s2063_s17, %s2063_s17 }
  0x48   : > { %p2066_p7 = pnand %p2064_p5, %p2024_p13  ;;  %p2073_p1 = por %p2072_p0, %p2071_p12 }
  0x4a   : > { %p2067_p9 = pneg %p2066_p7 }
  0x4c   : > { %p2074_p2 = pnand %p2073_p1, %p2067_p9 }
  0x4e   : > { %2077 = shalt.err (!%p2074_p2)
}
  0x4f   : > { %s2238_s27 = smov 64   ;;  %s2239_s14 = smov 4  }
  0x50   : > { %1835 = dma.hbm_to_vmem [thread:$0]  (!%p2352_p11), %s3014_s4, 2048, %s2356_s20, [#allocation9], %s2238_s27, %s2238_s27, %s2239_s14  }
  0x51   : > { %s40_s24 = sadd.s32 1, %s2228_s9  ;;  %s49_s25 = sadd.s32 1, %s2220_s29 }
  0x52   : > { %p42_p13 = scmp.ge.s32.totalorder %s40_s24, 2  ;;  %p56_p6 = scmp.ne.s32.totalorder %s2220_s29, %s2216_s28 }
  0x53   : > { %p57_p10 = scmp.eq.s32.totalorder %s2232_s10, 0  ;;  %p1849_p3 = scmp.lt.s32.totalorder %s2232_s10, 2 }
  0x54   : > { %s3042_s24 = smov (%p42_p13, %s40_s24), 0  ;;  %p3016_p7 = scmp.eq.s32.totalorder %s2322_s11, 1 }
  0x55   : > { %3015 = sst [smem:[#allocation19_spill]] %s3042_s24  ;;  %p58_p5 = por %p57_p10, %p56_p6 }
  0x56   : > { %p2423_p9 = por %p3016_p7, %p56_p6  ;;  %s44_s18 = ssub.s32 %s2228_s9, %s3042_s24 }
  0x57   : > { %s2430_s12 = sand.u32 1, %s2220_s29   ;;  %p47_p11 = scmp.eq.s32.totalorder %s44_s18, 0 }
  0x58   : > { %s3017_s26 = scalar_select %p2423_p9, 1, 0 }
  0x59   : > { %s1811_s20 = smul.u32 96, %s2430_s12  ;;  %p2433_p12 = pnand %p1849_p3, %p58_p5 }
  0x5a   : > { %s2438_s17 = scalar_select %p47_p11, %s2220_s29, %s49_s25  }
  0x5b   : > { %s1812_s27 = smul.u32 1536, %s2228_s9  ;;  %s310_s14 = scalar_lea.vmem [#allocation2], %s1811_s20 }
  0x5c   : > { %3019 = sst [smem:[#allocation20_spill]] %s2438_s17  ;;  %s319_s22 = sshll.u32 %s310_s14, 4  ;;  %s2446_s22 = int_to_ptr.vmem [resolvable:$true] %s319_s22 }
  0x5d   : > { %s3020_s0 = sld [smem:[#allocation21_spill]]  ;;  %s307_s18 = scalar_lea.sflag [#allocation3], %s2430_s12 }
  0x5e   : > { %p2080_p1 = pneg %p2433_p12 }
  0x63   : > { %s2444_s21 = scalar_lea.hbm %s3020_s0, %s1812_s27  ;;  %s2083_s19 = scalar_lea.hbm %s3020_s0, 3072 }
  0x64   : > { %s2078_s2 = scalar_lea.hbm %s2444_s21, 1536  ;;  %p2084_p6 = scmp.lt.u32.totalorder %s2444_s21, %s3020_s0 }
  0x65   : > { %p2079_p0 = scmp.ne.s32.totalorder %s2444_s21, %s2078_s2  ;;  %p2085_p10 = scmp.lt.u32.totalorder %s2083_s19, %s2078_s2 }
  0x66   : > { %p2087_p5 = scmp.lt.u32.totalorder %s2078_s2, %s2444_s21 }
  0x67   : > { %p2081_p2 = pnand %p2080_p1, %p2079_p0  ;;  %p2086_p3 = por %p2085_p10, %p2084_p6 }
  0x69   : > { %p2082_p13 = pneg %p2081_p2  ;;  %p2088_p7 = por %p2087_p5, %p2086_p3 }
  0x6b   : > { %p2089_p11 = pnand %p2088_p7, %p2082_p13 }
  0x6d   : > { %2092 = shalt.err (!%p2089_p11)
}
  0x6e   : > { %s2093_s23 = scalar_lea.vmem %s2446_s22, 1536  ;;  %s2240_s25 = smov [#allocation2]  }
  0x6f   : > { %p2094_p0 = scmp.ne.s32.totalorder %s2446_s22, %s2093_s23  ;;  %s2098_s20 = sshll.u32 %s2240_s25, 4  ;;  %s2099_s20 = int_to_ptr.vmem [resolvable:$false] %s2098_s20 }
  0x70   : > { %s2100_s27 = scalar_lea.vmem %s2099_s20, 3072  ;;  %p2101_p4 = scmp.lt.s32.totalorder %s2446_s22, %s2099_s20 }
  0x71   : > { %p2096_p2 = pnand %p2094_p0, %p2080_p1  ;;  %p2102_p6 = scmp.lt.s32.totalorder %s2100_s27, %s2093_s23 }
  0x73   : > { %p2097_p9 = pneg %p2096_p2  ;;  %p2103_p10 = por %p2102_p6, %p2101_p4 }
  0x75   : > { %p2104_p3 = pnand %p2103_p10, %p2097_p9 }
  0x77   : > { %2107 = shalt.err (!%p2104_p3)
}
  0x78   : > { %s3021_s2 = smov 8   ;;  %s3022_s19 = smov 128  }
  0x79   : > { %1839 = dma.hbm_to_vmem [thread:$0]  (!%p2433_p12), %s2444_s21, 1536, %s2446_s22, %s307_s18, %s3022_s19, %s3022_s19, %s3021_s2  }
  0x7a   : > { %s329_s14 = sand.u32 1, %s2232_s10   ;;  %s1619_s25 = sshll.u32 %s2430_s12, 1 }
  0x7b   : > { %s1620_s23 = sshll.u32 %s2228_s9, 5  ;;  %s333_s20 = scalar_lea.vmem [#allocation5], %s1619_s25 }
  0x7c   : > { %s341_s27 = sshll.u32 %s333_s20, 4  ;;  %s2485_s24 = scalar_lea.hbm %s2985_s1, %s1620_s23  ;;  %s342_s27 = int_to_ptr.vmem [resolvable:$true] %s341_s27 }
  0x7d   : > { %s330_s17 = scalar_lea.sflag [#allocation6], %s329_s14  ;;  %s2108_s29 = scalar_lea.hbm %s2485_s24, 32 }
  0x7e   : > { %p2109_p4 = scmp.ne.s32.totalorder %s2485_s24, %s2108_s29  ;;  %s2113_s22 = scalar_lea.hbm %s2985_s1, 64 }
  0x7f   : > { %p2114_p5 = scmp.lt.u32.totalorder %s2485_s24, %s2985_s1  ;;  %p2115_p7 = scmp.lt.u32.totalorder %s2113_s22, %s2108_s29 }
  0x80   : > { %p2111_p9 = pnand %p2109_p4, %p2080_p1  ;;  %p2117_p0 = scmp.lt.u32.totalorder %s2108_s29, %s2485_s24 }
  0x81   : > { %p2116_p11 = por %p2115_p7, %p2114_p5 }
  0x82   : > { %p2112_p13 = pneg %p2111_p9 }
  0x83   : > { %p2118_p2 = por %p2117_p0, %p2116_p11 }
  0x85   : > { %p2119_p6 = pnand %p2118_p2, %p2112_p13 }
  0x87   : > { %2122 = shalt.err (!%p2119_p6)
}
  0x88   : > { %s2123_s4 = scalar_lea.vmem %s342_s27, 32  ;;  %s2241_s2 = smov [#allocation5]  }
  0x89   : > { %p2124_p10 = scmp.ne.s32.totalorder %s342_s27, %s2123_s4  ;;  %s2128_s19 = sshll.u32 %s2241_s2, 4  ;;  %s2129_s19 = int_to_ptr.vmem [resolvable:$false] %s2128_s19 }
  0x8a   : > { %s2130_s14 = scalar_lea.vmem %s2129_s19, 64  ;;  %p2131_p9 = scmp.lt.s32.totalorder %s342_s27, %s2129_s19 }
  0x8b   : > { %p2126_p3 = pnand %p2124_p10, %p2080_p1  ;;  %p2132_p8 = scmp.lt.s32.totalorder %s2130_s14, %s2123_s4 }
  0x8d   : > { %p2127_p4 = pneg %p2126_p3  ;;  %p2133_p5 = por %p2132_p8, %p2131_p9 }
  0x8f   : > { %p2134_p7 = pnand %p2133_p5, %p2127_p4 }
  0x91   : > { %2137 = shalt.err (!%p2134_p7)
}
  0x92   : > { %1842 = dma.hbm_to_vmem [thread:$0]  (!%p2433_p12), %s2485_s24, 32, %s342_s27, %s330_s17  }
  0x93   : > { %p3023_p13 = scmp.ne.s32.totalorder %s3011_s15, 0 }
  0x94   : > { %s2509_s29 = sand.u32 (!%p3023_p13), 1, %s2216_s28   ;;  %p3024_p8 = scmp.ne.s32.totalorder (!%p3023_p13), %s3008_s13, 0 }
  0x95   : > { %350 = sbr.rel (%p3023_p13) target bundleno = 1089 (0x441), region = 52  ;;  %s353_s23 = scalar_lea.sflag (!%p3023_p13), [#allocation3], %s2509_s29 }
  0x96   : > { %s1813_s25 = smul.u32 (!%p3023_p13), 96, %s2509_s29 }
  0x98   : > { %s2515_s20 = scalar_lea.vmem (!%p3023_p13), [#allocation2], %s1813_s25 }
  0x9c   : > { %2191 = dma.done.wait (%p3024_p8), %s353_s23, 1536  }
  0x9d   : > { %2193 = vsyncadd (%p3024_p8), %s353_s23, 4294965760  ;;  %s361_s15 = sand.u32 1, %s2322_s11   ;;  %s1622_s24 = sshll.u32 %s2509_s29, 1 }
  0x9e   : > { %s362_s16 = scalar_lea.sflag [#allocation6], %s361_s15  ;;  %s2523_s17 = scalar_lea.vmem [#allocation5], %s1622_s24 }
  0x9f   : > { %2195 = dma.done.wait (%p3024_p8), %s362_s16, 32  }
  0xa0   : > { %2197 = vsyncadd (%p3024_p8), %s362_s16, 4294967264  ;;  %p3025_p12 = scmp.eq.s32.totalorder %s2322_s11, 0 }
  0xa2   : > { %2199 = dma.done.wait (%p3025_p12), [#allocation6], 6144   ;;  %p3026_p1 = pmov %p3025_p12 }
  0xa4   : > { %2201 = vsyncadd (%p3026_p1), [#allocation6], 4294961152  ;;  %p3027_p11 = pmov %p3026_p1 }
  0xa5   : > { %p3028_p0 = pmov %p3026_p1 }
  0xa6   : > { %2203 = dma.done.wait (%p3027_p11), [#allocation9], 2048  }
  0xa7   : > { %2205 = vsyncadd (%p3028_p0), [#allocation9], 4294965248  ;;  %v2242_v0 = vmov 0   ;;  %v1910_v1 = vld [vmem:[#allocation7 + $0x4] ss:$8 sps:$4 sm:$0xff]   ;;  %v2567_v29 = vld [vmem:[%s2515_s20] sm:$0xff] }
  0xa8   : > { %969 = vmatprep.mubr.bf16.mxu1 %v2242_v0  ;;  %v1912_v2 = vld [vmem:[#allocation7] ss:$8 sps:$4 sm:$0xff]   ;;  %834 = vmatprep.subr.bf16.mxu0 %v1910_v1  ;;  %v1913_v3 = vld [vmem:[#allocation7 + $0x14] ss:$8 sps:$4 sm:$0xff]   ;;  %v1915_v4 = vld [vmem:[#allocation7 + $0x10] ss:$8 sps:$4 sm:$0xff]  }
  0xa9   : > { %835 = vmatpush1.bf16.msra.mxu0 %v1912_v2  ;;  %v1916_v5 = vld [vmem:[#allocation7 + $0x24] ss:$8 sps:$4 sm:$0xff]   ;;  %v1918_v6 = vld [vmem:[#allocation7 + $0x20] ss:$8 sps:$4 sm:$0xff]   ;;  %v1919_v7 = vld [vmem:[#allocation7 + $0x34] ss:$8 sps:$4 sm:$0xff]  }
  0xaa   : > { %836 = vmatprep.subr.bf16.mxu0 %v1913_v3  ;;  %v1921_v8 = vld [vmem:[#allocation7 + $0x30] ss:$8 sps:$4 sm:$0xff]   ;;  %v1922_v9 = vld [vmem:[#allocation7 + $0x44] ss:$8 sps:$4 sm:$0xff]   ;;  %v1924_v10 = vld [vmem:[#allocation7 + $0x40] ss:$8 sps:$4 sm:$0xff]  }
  0xab   : > { %v2538_v11 = vld [vmem:[#allocation7 + $0x104] ss:$8 sps:$4 sm:$0xff]   ;;  %v2540_v12 = vld [vmem:[#allocation7 + $0x100] ss:$8 sps:$4 sm:$0xff]   ;;  %v1925_v13 = vld [vmem:[#allocation7 + $0x54] ss:$8 sps:$4 sm:$0xff]  }
  0xac   : > { %1747 = vmatprep.subr.bf16.mxu1 %v2538_v11  ;;  %v2544_v14 = vld [vmem:[#allocation7 + $0x114] ss:$8 sps:$4 sm:$0xff]   ;;  %v2546_v15 = vld [vmem:[#allocation7 + $0x110] ss:$8 sps:$4 sm:$0xff]   ;;  %v1928_v17 = vld [vmem:[#allocation7 + $0x64] ss:$8 sps:$4 sm:$0xff]  }
  0xad   : > { %837 = vmatpush1.bf16.msra.mxu0 %v1915_v4  ;;  %1755 = vmatpush1.bf16.msra.mxu1 %v2540_v12  ;;  %v1927_v16 = vld [vmem:[#allocation7 + $0x50] ss:$8 sps:$4 sm:$0xff]   ;;  %v2549_v18 = vld [vmem:[#allocation7 + $0x124] ss:$8 sps:$4 sm:$0xff]   ;;  %v2552_v19 = vld [vmem:[#allocation7 + $0x120] ss:$8 sps:$4 sm:$0xff]  }
  0xae   : > { %838 = vmatprep.subr.bf16.mxu0 %v1916_v5  ;;  %1748 = vmatprep.subr.bf16.mxu1 %v2544_v14  ;;  %v1930_v20 = vld [vmem:[#allocation7 + $0x60] ss:$8 sps:$4 sm:$0xff]   ;;  %v2555_v21 = vld [vmem:[#allocation7 + $0x134] ss:$8 sps:$4 sm:$0xff]   ;;  %v2558_v23 = vld [vmem:[#allocation7 + $0x130] ss:$8 sps:$4 sm:$0xff]  }
  0xaf   : > { %v1931_v22 = vld [vmem:[#allocation7 + $0x74] ss:$8 sps:$4 sm:$0xff]   ;;  %v1933_v24 = vld [vmem:[#allocation7 + $0x70] ss:$8 sps:$4 sm:$0xff]   ;;  %v2561_v25 = vld [vmem:[#allocation7 + $0x144] ss:$8 sps:$4 sm:$0xff]  }
  0xb0   : > { %v1934_v26 = vld [vmem:[#allocation7 + $0x84] ss:$8 sps:$4 sm:$0xff]   ;;  %v1936_v27 = vld [vmem:[#allocation7 + $0x80] ss:$8 sps:$4 sm:$0xff]   ;;  %v2573_v31 = vld [vmem:[#allocation7 + $0x154] ss:$8 sps:$4 sm:$0xff]  }
  0xb1   : > { %839 = vmatpush1.bf16.msra.mxu0 %v1918_v6  ;;  %1756 = vmatpush1.bf16.msra.mxu1 %v2546_v15  ;;  %v2564_v28 = vld [vmem:[#allocation7 + $0x140] ss:$8 sps:$4 sm:$0xff]   ;;  %v1937_v33 = vld [vmem:[#allocation7 + $0x94] ss:$8 sps:$4 sm:$0xff]   ;;  %v2578_v34 = vld [vmem:[#allocation7 + $0x150] ss:$8 sps:$4 sm:$0xff]  }
  0xb2   : > { %840 = vmatprep.subr.bf16.mxu0 %v1919_v7  ;;  %1749 = vmatprep.subr.bf16.mxu1 %v2549_v18  ;;  %v2570_v30 = vld [vmem:[%s2515_s20 + $0x8] sm:$0xff]  ;;  %v1939_v35 = vld [vmem:[#allocation7 + $0x90] ss:$8 sps:$4 sm:$0xff]   ;;  %v2584_v37 = vld [vmem:[%s2515_s20 + $0x20] sm:$0xff]  ;;  %vm476_vm0 = vcmask 1046528   ;;  %v477_v39 = vrot.slane %v2567_v29, 1 }
  0xb3   : > { %v517_v32 = vpack.c.bf16 %v2570_v30, %v2567_v29  ;;  %v2581_v36 = vld [vmem:[#allocation7 + $0x164] ss:$8 sps:$4 sm:$0xff]   ;;  %v478_v40 = vrot.slane %v2570_v30, 1  ;;  %v1942_v42 = vld [vmem:[#allocation7 + $0xa0] ss:$8 sps:$4 sm:$0xff]   ;;  %v2594_v44 = vld [vmem:[%s2515_s20 + $0x18] sm:$0xff] }
  0xb4   : > { %v1940_v38 = vld [vmem:[#allocation7 + $0xa4] ss:$8 sps:$4 sm:$0xff]   ;;  %v2591_v43 = vld [vmem:[#allocation7 + $0x160] ss:$8 sps:$4 sm:$0xff]   ;;  %v1946_v46 = vld [vmem:[#allocation7 + $0xb4] ss:$8 sps:$4 sm:$0xff]  }
  0xb5   : > { %841 = vmatpush1.bf16.msra.mxu0 %v1921_v8  ;;  %1757 = vmatpush1.bf16.msra.mxu1 %v2552_v19  ;;  %v2589_v41 = vld [vmem:[%s2515_s20 + $0x10] sm:$0xff]  ;;  %v482_v47 = vrot.slane %v2594_v44, 1  ;;  %v484_v48 = vrot.slane %v2584_v37, 1  ;;  %v2601_v49 = vld [vmem:[#allocation7 + $0x174] ss:$8 sps:$4 sm:$0xff]   ;;  %v2613_v56 = vld [vmem:[%s2515_s20 + $0x28] sm:$0xff]  ;;  %v2616_v58 = vsel %vm476_vm0, %v477_v39, %v478_v40 }
  0xb6   : > { %842 = vmatprep.subr.bf16.mxu0 %v1922_v9  ;;  %1750 = vmatprep.subr.bf16.mxu1 %v2555_v21  ;;  %v480_v45 = vrot.slane %v2589_v41, 1  ;;  %v2603_v50 = vld [vmem:[#allocation7 + $0x170] ss:$8 sps:$4 sm:$0xff]   ;;  %v1952_v55 = vld [vmem:[#allocation7 + $0xc4] ss:$8 sps:$4 sm:$0xff]   ;;  %v486_v60 = vrot.slane %v2613_v56, 1 }
  0xb7   : > { %866 = vmatprep.mubr.bf16.mxu0 %v517_v32  ;;  %v485_v52 = vsel %vm476_vm0, %v482_v47, %v484_v48  ;;  %v2609_v53 = vld [vmem:[%s2515_s20 + $0x30] sm:$0xff]  ;;  %v1954_v57 = vld [vmem:[#allocation7 + $0xc0] ss:$8 sps:$4 sm:$0xff]   ;;  %v1958_v62 = vld [vmem:[#allocation7 + $0xd4] ss:$8 sps:$4 sm:$0xff]   ;;  %vm439_vm1 = vcmask 1040384  }
  0xb8   : > { %v483_v51 = vsel %vm476_vm0, %v480_v45, %v482_v47  ;;  %v1948_v54 = vld [vmem:[#allocation7 + $0xb0] ss:$8 sps:$4 sm:$0xff]   ;;  %v488_v61 = vrot.slane %v2609_v53, 1  ;;  %v2622_v63 = vsel %vm476_vm0, %v478_v40, %v480_v45  ;;  %v487_v2 = vsel %vm476_vm0, %v484_v48, %v486_v60  ;;  %v2630_v5 = vld [vmem:[%s2515_s20 + $0x40] sm:$0xff]  ;;  %v1964_v6 = vld [vmem:[#allocation7 + $0xe4] ss:$8 sps:$4 sm:$0xff]  }
  0xb9   : > { %843 = vmatpush1.bf16.msra.mxu0 %v1924_v10  ;;  %1758 = vmatpush1.bf16.msra.mxu1 %v2558_v23  ;;  %v521_v59 = vpack.c.bf16 %v485_v52, %v483_v51  ;;  %v518_v1 = vpack.c.bf16 %v2622_v63, %v2616_v58  ;;  %v1960_v4 = vld [vmem:[#allocation7 + $0xd0] ss:$8 sps:$4 sm:$0xff]   ;;  %v492_v10 = vrot.slane %v2630_v5, 1  ;;  %v2649_v39 = vld [vmem:[%s2515_s20 + $0x48] sm:$0xff]  ;;  %v443_v47 = vrot.slane %v2589_v41, 7  ;;  %s2882_s4 = scalar_lea.vmem [#allocation10], %s1813_s25 }
  0xba   : > { %844 = vmatprep.subr.bf16.mxu0 %v1925_v13  ;;  %1751 = vmatprep.subr.bf16.mxu1 %v2561_v25  ;;  %v489_v3 = vsel %vm476_vm0, %v486_v60, %v488_v61  ;;  %v2633_v8 = vld [vmem:[%s2515_s20 + $0x38] sm:$0xff]  ;;  %v1966_v13 = vld [vmem:[#allocation7 + $0xe0] ss:$8 sps:$4 sm:$0xff]   ;;  %v445_v48 = vrot.slane %v2594_v44, 7  ;;  %s1814_s2 = smul.u32 1536, %s2224_s30  ;;  %s1482_s19 = sshll.u32 %s2882_s4, 4  ;;  %s2932_s19 = int_to_ptr.vmem [resolvable:$true] %s1482_s19 }
  0xbb   : > { %v524_v7 = vpack.c.bf16 %v489_v3, %v487_v2  ;;  %v490_v9 = vrot.slane %v2633_v8, 1  ;;  %v449_v2 = vrot.slane %v2613_v56, 7  ;;  %v1992_v58 = vld [vmem:[#allocation8 + $0x68] sm:$0xff]   ;;  %s1467_s30 = scalar_lea.sflag [#allocation4], %s2509_s29  ;;  %p3029_p6 = scmp.ne.s32.totalorder %s3017_s26, 0 }
  0xbc   : > { %v1993_v63 = vld [vmem:[#allocation8 + $0x28] sm:$0xff]   ;;  %s2930_s23 = scalar_lea.hbm %s2992_s8, %s1814_s2  ;;  %s2243_s15 = smov [#allocation10]  }
  0xbd   : > { %845 = vmatpush1.bf16.msra.mxu0 %v1927_v16  ;;  %1759 = vmatpush1.bf16.msra.mxu1 %v2564_v28  ;;  %v440_v16 = vrot.slane %v2567_v29, 7  ;;  %s2142_s24 = sshll.u32 %s2243_s15, 4  ;;  %s2143_s24 = int_to_ptr.vmem [resolvable:$false] %s2142_s24 }
  0xbe   : > { %846 = vmatprep.subr.bf16.mxu0 %v1928_v17  ;;  %1752 = vmatprep.subr.bf16.mxu1 %v2573_v31  ;;  %v441_v17 = vrot.slane %v2570_v30, 7  ;;  %s2144_s16 = scalar_lea.vmem %s2143_s24, 3072  ;;  %p2145_p4 = scmp.lt.s32.totalorder %s2932_s19, %s2143_s24 }
  0xc0   : > { %v442_v32 = vsel %vm439_vm1, %v440_v16, %v441_v17 }
  0xc1   : > { %847 = vmatpush1.bf16.msra.mxu0 %v1930_v20  ;;  %1760 = vmatpush1.bf16.msra.mxu1 %v2578_v34  ;;  %v1970_v20 = vld [vmem:[#allocation7 + $0xf4] ss:$8 sps:$4 sm:$0xff]  }
  0xc2   : > { %848 = vmatprep.subr.bf16.mxu0 %v1931_v22  ;;  %1753 = vmatprep.subr.bf16.mxu1 %v2581_v36  ;;  %v426_v22 = vld [vmem:[%s2523_s17] sm:$0x3] }
  0xc5   : > { %849 = vmatpush1.bf16.msra.mxu0 %v1933_v24  ;;  %1761 = vmatpush1.bf16.msra.mxu1 %v2591_v43  ;;  %v491_v24 = vsel %vm476_vm0, %v488_v61, %v490_v9 }
  0xc6   : > { %850 = vmatprep.subr.bf16.mxu0 %v1934_v26  ;;  %1754 = vmatprep.subr.bf16.mxu1 %v2601_v49  ;;  %v493_v26 = vsel %vm476_vm0, %v490_v9, %v492_v10  ;;  %v451_v9 = vrot.slane %v2609_v53, 7 }
  0xc9   : > { %851 = vmatpush1.bf16.msra.mxu0 %v1936_v27  ;;  %1762 = vmatpush1.bf16.msra.mxu1 %v2603_v50  ;;  %v1972_v27 = vld [vmem:[#allocation7 + $0xf0] ss:$8 sps:$4 sm:$0xff]  }
  0xca   : > { %852 = vmatprep.subr.bf16.mxu0 %v1937_v33  ;;  %v475_v33 = vsel %vm439_vm1, %v426_v22, %v440_v16  ;;  %v455_v16 = vrot.slane %v2630_v5, 7 }
  0xcb   : > { %v516_v40 = vpack.c.bf16 %v442_v32, %v475_v33  ;;  %v1986_v32 = vld [vmem:[#allocation8 + $0x50] sm:$0xff]  }
  0xcc   : > { %970 = vmatmul.mubr.bf16.vlgmr.msra.gmra.mrb[0].mxu1 %v521_v59  ;;  %v2666_v59 = vld [vmem:[%s2515_s20 + $0x58] sm:$0xff] }
  0xcd   : > { %853 = vmatpush1.bf16.msra.mxu0 %v1939_v35  ;;  %979 = vmatprep.mubr.bf16.mxu1 %v2242_v0  ;;  %v2646_v35 = vld [vmem:[%s2515_s20 + $0x50] sm:$0xff]  ;;  %v498_v61 = vrot.slane %v2666_v59, 1  ;;  %s2138_s20 = scalar_lea.vmem %s2932_s19, 1536 }
  0xce   : > { %854 = vmatprep.subr.bf16.mxu0 %v1940_v38  ;;  %v527_v38 = vpack.c.bf16 %v493_v26, %v491_v24  ;;  %v496_v45 = vrot.slane %v2646_v35, 1  ;;  %v1987_v33 = vld [vmem:[#allocation8 + $0x10] sm:$0xff]   ;;  %p2139_p2 = scmp.ne.s32.totalorder %s2932_s19, %s2138_s20  ;;  %p2146_p9 = scmp.lt.s32.totalorder %s2144_s16, %s2138_s20 }
  0xd0   : > { %p2140_p10 = pnand %p2139_p2, %p3029_p6  ;;  %p2147_p5 = por %p2146_p9, %p2145_p4 }
  0xd1   : > { %855 = vmatpush1.bf16.msra.mxu0 %v1942_v42  ;;  %v494_v42 = vrot.slane %v2649_v39, 1 }
  0xd2   : > { %856 = vmatprep.subr.bf16.mxu0 %v1946_v46  ;;  %v520_v46 = vpack.c.bf16 %v2594_v44, %v2589_v41  ;;  %p2141_p3 = pneg %p2140_p10 }
  0xd3   : > { %v495_v51 = vsel %vm476_vm0, %v492_v10, %v494_v42  ;;  %v497_v52 = vsel %vm476_vm0, %v494_v42, %v496_v45  ;;  %v453_v10 = vrot.slane %v2633_v8, 7  ;;  %v1991_v42 = vld [vmem:[#allocation8 + $0x20] sm:$0xff]  }
  0xd4   : > { %980 = vmatmul.mubr.bf16.gmra.mrb[4].mxu1 %v524_v7  ;;  %p2148_p7 = pnand %p2147_p5, %p2141_p3 }
  0xd5   : > { %857 = vmatpush1.bf16.msra.mxu0 %v1948_v54  ;;  %989 = vmatprep.mubr.bf16.mxu1 %v2242_v0  ;;  %v444_v54 = vsel %vm439_vm1, %v441_v17, %v443_v47  ;;  %v456_v17 = vsel %vm439_vm1, %v453_v10, %v455_v16 }
  0xd6   : > { %858 = vmatprep.subr.bf16.mxu0 %v1952_v55  ;;  %v446_v55 = vsel %vm439_vm1, %v443_v47, %v445_v48  ;;  %v1997_v47 = vld [vmem:[#allocation8 + $0x38] sm:$0xff]  }
  0xd7   : > { %v519_v60 = vpack.c.bf16 %v446_v55, %v444_v54 }
  0xd9   : > { %859 = vmatpush1.bf16.msra.mxu0 %v1954_v57  ;;  %v530_v57 = vpack.c.bf16 %v497_v52, %v495_v51 }
  0xda   : > { %860 = vmatprep.subr.bf16.mxu0 %v1958_v62  ;;  %v523_v62 = vpack.c.bf16 %v2613_v56, %v2584_v37 }
  0xdc   : > { %990 = vmatmul.mubr.bf16.gmra.mrb[8].mxu1 %v527_v38  ;;  %v1988_v38 = vld [vmem:[#allocation8 + $0x58] sm:$0xff]  }
  0xdd   : > { %861 = vmatpush1.bf16.msra.mxu0 %v1960_v4  ;;  %999 = vmatprep.mubr.bf16.mxu1 %v2242_v0 }
  0xde   : > { %862 = vmatprep.subr.bf16.mxu0 %v1964_v6 }
  0xe1   : > { %863 = vmatpush1.bf16.msra.mxu0 %v1966_v13  ;;  %v529_v13 = vpack.c.bf16 %v2649_v39, %v2630_v5 }
  0xe2   : > { %864 = vmatprep.subr.bf16.mxu0 %v1970_v20  ;;  %v459_v20 = vrot.slane %v2646_v35, 7 }
  0xe4   : > { %1000 = vmatmul.mubr.bf16.gmra.mrb[12].mxu1 %v530_v57 }
  0xe5   : > { %865 = vmatpush1.bf16.msra.mxu0 %v1972_v27  ;;  %1009 = vmatprep.mubr.bf16.mxu1 %v2242_v0  ;;  %v1984_v27 = vld [vmem:[#allocation8 + $0x48] sm:$0xff]  }
  0xe6   : > { %927 = vmatprep.subr.bf16.mxu0 %v2538_v11  ;;  %v513_v11 = vrot.slane %v426_v22, 2  ;;  %v461_v22 = vrot.slane %v2666_v59, 7 }
  0xe8   : > { %867 = vmatmul.mubr.bf16.vlgmr.msra.gmra.mrb[0].mxu0 %v516_v40  ;;  %v515_v3 = vsel %vm476_vm0, %v498_v61, %v513_v11  ;;  %v462_v24 = vsel %vm439_vm1, %v459_v20, %v461_v22  ;;  %v1989_v40 = vld [vmem:[#allocation8 + $0x18] sm:$0xff]   ;;  %v584_v11 = vlaneseq }
  0xe9   : > { %928 = vmatpush1.bf16.msra.mxu0 %v2540_v12  ;;  %876 = vmatprep.mubr.bf16.mxu0 %v520_v46  ;;  %v447_v12 = vrot.slane %v2584_v37, 7  ;;  %v1996_v46 = vld [vmem:[#allocation8 + $0x78] sm:$0xff]  }
  0xea   : > { %929 = vmatprep.subr.bf16.mxu0 %v2544_v14  ;;  %v499_v14 = vsel %vm476_vm0, %v496_v45, %v498_v61  ;;  %v1995_v45 = vld [vmem:[#allocation8 + $0x30] sm:$0xff]  }
  0xeb   : > { %v450_v4 = vsel %vm439_vm1, %v447_v12, %v449_v2  ;;  %v533_v6 = vpack.c.bf16 %v515_v3, %v499_v14 }
  0xed   : > { %930 = vmatpush1.bf16.msra.mxu0 %v2546_v15  ;;  %v448_v15 = vsel %vm439_vm1, %v445_v48, %v447_v12  ;;  %1010 = vmatmul.mubr.bf16.gmra.mrb[16].mxu1 %v533_v6 }
  0xee   : > { %931 = vmatprep.subr.bf16.mxu0 %v2549_v18  ;;  %v522_v7 = vpack.c.bf16 %v450_v4, %v448_v15  ;;  %v526_v18 = vpack.c.bf16 %v2633_v8, %v2609_v53  ;;  %v582_v15 = vld [vmem:[%s2987_s3] sm:$0x3] }
  0xf0   : > { %877 = vmatmul.mubr.bf16.gmra.mrb[4].mxu0 %v519_v60 }
  0xf1   : > { %932 = vmatpush1.bf16.msra.mxu0 %v2552_v19  ;;  %886 = vmatprep.mubr.bf16.mxu0 %v523_v62  ;;  %v452_v19 = vsel %vm439_vm1, %v449_v2, %v451_v9  ;;  %v585_v62 = vshrl.u32 %v584_v11, 7 }
  0xf2   : > { %933 = vmatprep.subr.bf16.mxu0 %v2555_v21  ;;  %v454_v21 = vsel %vm439_vm1, %v451_v9, %v453_v10 }
  0xf3   : > { %v586_v14 = vsub.s32 0, %v585_v62  ;;  %v590_v4 = vsub.s32 1, %v585_v62 }
  0xf5   : > { %934 = vmatpush1.bf16.msra.mxu0 %v2558_v23  ;;  %v525_v23 = vpack.c.bf16 %v454_v21, %v452_v19 }
  0xf6   : > { %935 = vmatprep.subr.bf16.mxu0 %v2561_v25  ;;  %v457_v25 = vrot.slane %v2649_v39, 7 }
  0xf8   : > { %887 = vmatmul.mubr.bf16.gmra.mrb[8].mxu0 %v522_v7  ;;  %v2716_v7 = vrot.slane %v582_v15, %v586_v14 }
  0xf9   : > { %896 = vmatprep.mubr.bf16.mxu0 %v526_v18  ;;  %936 = vmatpush1.bf16.msra.mxu0 %v2564_v28  ;;  %v458_v28 = vsel %vm439_vm1, %v455_v16, %v457_v25  ;;  %v2718_v18 = vrot.slane %v582_v15, %v590_v4 }
  0xfa   : > { %937 = vmatprep.subr.bf16.mxu0 %v2573_v31  ;;  %v528_v31 = vpack.c.bf16 %v458_v28, %v456_v17 }
  0xfd   : > { %938 = vmatpush1.bf16.msra.mxu0 %v2578_v34  ;;  %v532_v34 = vpack.c.bf16 %v2666_v59, %v2646_v35 }
  0xfe   : > { %939 = vmatprep.subr.bf16.mxu0 %v2581_v36  ;;  %v460_v36 = vsel %vm439_vm1, %v457_v25, %v459_v20 }
  0xff   : > { %v531_v26 = vpack.c.bf16 %v462_v24, %v460_v36 }
 0x100   : > { %897 = vmatmul.mubr.bf16.gmra.mrb[12].mxu0 %v525_v23 }
 0x101   : > { %906 = vmatprep.mubr.bf16.mxu0 %v529_v13  ;;  %940 = vmatpush1.bf16.msra.mxu0 %v2591_v43  ;;  %v1982_v43 = vld [vmem:[#allocation8 + $0x40] sm:$0xff]  }
 0x102   : > { %941 = vmatprep.subr.bf16.mxu0 %v2601_v49  ;;  %1695 = vmatprep.subr.bf16.mxu1 %v1982_v43  ;;  %v1983_v49 = vld [vmem:[#allocation8] sm:$0xff]  }
 0x103   : > { %1696 = vmatpush3.bf16.msra.mxu1 %v1983_v49 }
 0x104   : > { %1697 = vmatprep.subr.bf16.mxu1 %v1984_v27 }
 0x105   : > { %942 = vmatpush1.bf16.msra.mxu0 %v2603_v50  ;;  %v1985_v50 = vld [vmem:[#allocation8 + $0x8] sm:$0xff]  }
 0x107   : > { %1698 = vmatpush3.bf16.msra.mxu1 %v1985_v50 }
 0x108   : > { %907 = vmatmul.mubr.bf16.gmra.mrb[16].mxu0 %v528_v31  ;;  %1699 = vmatprep.subr.bf16.mxu1 %v1986_v32 }
 0x109   : > { %916 = vmatprep.mubr.bf16.mxu0 %v532_v34 }
 0x10b   : > { %1700 = vmatpush3.bf16.msra.mxu1 %v1987_v33 }
 0x10c   : > { %1701 = vmatprep.subr.bf16.mxu1 %v1988_v38 }
 0x10f   : > { %1702 = vmatpush3.bf16.msra.mxu1 %v1989_v40 }
 0x110   : > { %917 = vmatmul.mubr.bf16.gmra.mrb[20].mxu0 %v531_v26 }
 0x111   : > { %959 = vmatprep.mubr.bf16.mxu0 %v2242_v0  ;;  %v1990_v0 = vld [vmem:[#allocation8 + $0x60] sm:$0xff]  }
 0x112   : > { %1703 = vmatprep.subr.bf16.mxu1 %v1990_v0 }
 0x113   : > { %1704 = vmatpush3.bf16.msra.mxu1 %v1991_v42 }
 0x114   : > { %1705 = vmatprep.subr.bf16.mxu1 %v1992_v58 }
 0x117   : > { %1706 = vmatpush3.bf16.msra.mxu1 %v1993_v63 }
 0x118   : > { %960 = vmatmul.mubr.bf16.vlgmr.msra.gmra.mrb[0].mxu0 %v518_v1  ;;  %v1994_v1 = vld [vmem:[#allocation8 + $0x70] sm:$0xff]  }
 0x119   : > { %1707 = vmatprep.subr.bf16.mxu1 %v1994_v1 }
 0x11b   : > { %1708 = vmatpush3.bf16.msra.mxu1 %v1995_v45 }
 0x11c   : > { %1709 = vmatprep.subr.bf16.mxu1 %v1996_v46 }
 0x11f   : > { %1710 = vmatpush3.bf16.msra.mxu1 %v1997_v47 }
 0x19f   : > { %v971_v48 = vpop.f32.mrb[0].mxu1 }
 0x1a0   : > { %v973_v51 = vpop.f32.mrb[1].mxu1 }
 0x1a1   : > { %v975_v52 = vpop.f32.mrb[2].mxu1 }
 0x1a2   : > { %v977_v54 = vpop.f32.mrb[3].mxu1 }
 0x1a7   : > { %v981_v55 = vpop.f32.mrb[4].mxu1 }
 0x1a8   : > { %v983_v57 = vpop.f32.mrb[5].mxu1 }
 0x1a9   : > { %v985_v60 = vpop.f32.mrb[6].mxu1 }
 0x1aa   : > { %v987_v61 = vpop.f32.mrb[7].mxu1 }
 0x1af   : > { %v991_v12 = vpop.f32.mrb[8].mxu1 }
 0x1b0   : > { %v993_v2 = vpop.f32.mrb[9].mxu1 }
 0x1b1   : > { %v995_v3 = vpop.f32.mrb[10].mxu1 }
 0x1b2   : > { %v997_v6 = vpop.f32.mrb[11].mxu1 }
 0x1b7   : > { %v2720_v9 = vpop.f32.mrb[12].mxu1 }
 0x1b8   : > { %v2722_v19 = vpop.f32.mrb[13].mxu1 }
 0x1b9   : > { %v2725_v13 = vpop.f32.mrb[14].mxu1 }
 0x1ba   : > { %v2728_v17 = vpop.f32.mrb[15].mxu1 }
 0x1c0   : > { %v2732_v49 = vpop.f32.mrb[16].mxu1 }
 0x1c1   : > { %v2734_v33 = vpop.f32.mrb[17].mxu1 }
 0x1c2   : > { %v2739_v42 = vpop.f32.mrb[18].mxu1 }
 0x1c3   : > { %v878_v10 = vpop.f32.mrb[4].mxu0  ;;  %v1017_v45 = vpop.f32.mrb[19].mxu1 }
 0x1c4   : > { %v879_v21 = vadd.f32 %v878_v10, %v2716_v7  ;;  %v880_v23 = vpop.f32.mrb[5].mxu0 }
 0x1c5   : > { %v881_v16 = vadd.f32 %v880_v23, %v2718_v18  ;;  %v882_v25 = vpop.f32.mrb[6].mxu0 }
 0x1c6   : > { %v883_v28 = vadd.f32 %v882_v25, %v2716_v7  ;;  %v972_v31 = vadd.f32 %v971_v48, %v879_v21  ;;  %v884_v34 = vpop.f32.mrb[7].mxu0 }
 0x1c7   : > { %v885_v20 = vadd.f32 %v884_v34, %v2718_v18  ;;  %v974_v22 = vadd.f32 %v973_v51, %v881_v16 }
 0x1c8   : > { %v976_v36 = vadd.f32 %v975_v52, %v883_v28  ;;  %v1024_v26 = vmax.f32 %v972_v31, 0.0 }
 0x1c9   : > { %v978_v24 = vadd.f32 %v977_v54, %v885_v20  ;;  %v1025_v27 = vmax.f32 %v974_v22, 0.0 }
 0x1ca   : > { %v1026_v43 = vmax.f32 %v976_v36, 0.0 }
 0x1cb   : > { %v1027_v50 = vmax.f32 %v978_v24, 0.0  ;;  %v888_v32 = vpop.f32.mrb[8].mxu0 }
 0x1cc   : > { %v2736_v38 = vpack.c.bf16 %v1026_v43, %v1024_v26  ;;  %v889_v40 = vadd.f32 %v888_v32, %v2716_v7  ;;  %v890_v0 = vpop.f32.mrb[9].mxu0 }
 0x1cd   : > { %v2741_v58 = vpack.c.bf16 %v1027_v50, %v1025_v27  ;;  %v891_v63 = vadd.f32 %v890_v0, %v2718_v18  ;;  %v892_v1 = vpop.f32.mrb[10].mxu0 }
 0x1ce   : > { %v893_v46 = vadd.f32 %v892_v1, %v2716_v7  ;;  %v982_v47 = vadd.f32 %v981_v55, %v889_v40  ;;  %v894_v48 = vpop.f32.mrb[11].mxu0 }
 0x1cf   : > { %v895_v51 = vadd.f32 %v894_v48, %v2718_v18  ;;  %v984_v52 = vadd.f32 %v983_v57, %v891_v63 }
 0x1d0   : > { %v986_v54 = vadd.f32 %v985_v60, %v893_v46  ;;  %v1028_v62 = vmax.f32 %v982_v47, 0.0 }
 0x1d1   : > { %v988_v11 = vadd.f32 %v987_v61, %v895_v51  ;;  %v1029_v15 = vmax.f32 %v984_v52, 0.0 }
 0x1d2   : > { %v1030_v14 = vmax.f32 %v986_v54, 0.0 }
 0x1d3   : > { %v1031_v4 = vmax.f32 %v988_v11, 0.0  ;;  %v898_v10 = vpop.f32.mrb[12].mxu0 }
 0x1d4   : > { %v2746_v21 = vpack.c.bf16 %v1030_v14, %v1028_v62  ;;  %v899_v23 = vadd.f32 %v898_v10, %v2716_v7  ;;  %v900_v16 = vpop.f32.mrb[13].mxu0 }
 0x1d5   : > { %v2749_v25 = vpack.c.bf16 %v1031_v4, %v1029_v15  ;;  %v901_v55 = vadd.f32 %v900_v16, %v2718_v18  ;;  %v902_v28 = vpop.f32.mrb[14].mxu0 }
 0x1d6   : > { %v903_v31 = vadd.f32 %v902_v28, %v2716_v7  ;;  %v992_v57 = vadd.f32 %v991_v12, %v899_v23  ;;  %v904_v60 = vpop.f32.mrb[15].mxu0 }
 0x1d7   : > { %v905_v61 = vadd.f32 %v904_v60, %v2718_v18  ;;  %v994_v34 = vadd.f32 %v993_v2, %v901_v55 }
 0x1d8   : > { %v996_v20 = vadd.f32 %v995_v3, %v903_v31  ;;  %v1032_v36 = vmax.f32 %v992_v57, 0.0 }
 0x1d9   : > { %v998_v22 = vadd.f32 %v997_v6, %v905_v61  ;;  %v1033_v26 = vmax.f32 %v994_v34, 0.0 }
 0x1da   : > { %v1034_v24 = vmax.f32 %v996_v20, 0.0 }
 0x1db   : > { %v1035_v43 = vmax.f32 %v998_v22, 0.0  ;;  %v908_v27 = vpop.f32.mrb[16].mxu0 }
 0x1dc   : > { %v1050_v50 = vpack.c.bf16 %v1034_v24, %v1032_v36  ;;  %v909_v32 = vadd.f32 %v908_v27, %v2716_v7  ;;  %v910_v40 = vpop.f32.mrb[17].mxu0 }
 0x1dd   : > { %v1051_v0 = vpack.c.bf16 %v1035_v43, %v1033_v26  ;;  %v911_v63 = vadd.f32 %v910_v40, %v2718_v18  ;;  %v912_v1 = vpop.f32.mrb[18].mxu0 }
 0x1de   : > { %v913_v12 = vadd.f32 %v912_v1, %v2716_v7  ;;  %v1002_v46 = vadd.f32 %v2720_v9, %v909_v32  ;;  %v914_v2 = vpop.f32.mrb[19].mxu0 }
 0x1df   : > { %v915_v3 = vadd.f32 %v914_v2, %v2718_v18  ;;  %v1004_v6 = vadd.f32 %v2722_v19, %v911_v63 }
 0x1e0   : > { %v1006_v47 = vadd.f32 %v2725_v13, %v913_v12  ;;  %v1036_v51 = vmax.f32 %v1002_v46, 0.0 }
 0x1e1   : > { %v1008_v48 = vadd.f32 %v2728_v17, %v915_v3  ;;  %v1037_v54 = vmax.f32 %v1004_v6, 0.0 }
 0x1e2   : > { %v1038_v52 = vmax.f32 %v1006_v47, 0.0 }
 0x1e3   : > { %v1039_v11 = vmax.f32 %v1008_v48, 0.0  ;;  %v918_v62 = vpop.f32.mrb[20].mxu0 }
 0x1e4   : > { %v1052_v14 = vpack.c.bf16 %v1038_v52, %v1036_v51  ;;  %v919_v15 = vadd.f32 %v918_v62, %v2716_v7  ;;  %v920_v4 = vpop.f32.mrb[21].mxu0 }
 0x1e5   : > { %v1053_v10 = vpack.c.bf16 %v1039_v11, %v1037_v54  ;;  %v921_v9 = vadd.f32 %v920_v4, %v2718_v18  ;;  %v922_v23 = vpop.f32.mrb[22].mxu0 }
 0x1e6   : > { %v923_v16 = vadd.f32 %v922_v23, %v2716_v7  ;;  %v1012_v19 = vadd.f32 %v2732_v49, %v919_v15  ;;  %v924_v13 = vpop.f32.mrb[23].mxu0 }
 0x1e7   : > { %v925_v17 = vadd.f32 %v924_v13, %v2718_v18  ;;  %v1014_v55 = vadd.f32 %v2734_v33, %v921_v9 }
 0x1e8   : > { %v1016_v28 = vadd.f32 %v2739_v42, %v923_v16  ;;  %v1040_v57 = vmax.f32 %v1012_v19, 0.0 }
 0x1e9   : > { %v1018_v31 = vadd.f32 %v1017_v45, %v925_v17  ;;  %v1041_v61 = vmax.f32 %v1014_v55, 0.0 }
 0x1ea   : > { %v1042_v60 = vmax.f32 %v1016_v28, 0.0 }
 0x1eb   : > { %v1043_v34 = vmax.f32 %v1018_v31, 0.0  ;;  %v961_v20 = vpop.f32.mrb[0].mxu0 }
 0x1ec   : > { %v1054_v22 = vpack.c.bf16 %v1042_v60, %v1040_v57  ;;  %v1763_v36 = vadd.f32 %v961_v20, %v2716_v7  ;;  %v963_v24 = vpop.f32.mrb[1].mxu0 }
 0x1ed   : > { %v1055_v26 = vpack.c.bf16 %v1043_v34, %v1041_v61  ;;  %v1764_v49 = vadd.f32 %v963_v24, %v2718_v18  ;;  %v965_v43 = vpop.f32.mrb[2].mxu0 }
 0x1ee   : > { %v1765_v27 = vadd.f32 %v965_v43, %v2716_v7  ;;  %v967_v32 = vpop.f32.mrb[3].mxu0  ;;  %v1020_v42 = vmax.f32 %v1763_v36, 0.0 }
 0x1ef   : > { %v1766_v33 = vadd.f32 %v967_v32, %v2718_v18  ;;  %v1021_v40 = vmax.f32 %v1764_v49, 0.0  ;;  %v2780_v18 = vld [vmem:[%s2989_s5] ss:$0 sm:$0xff] }
 0x1f0   : > { %v1022_v45 = vmax.f32 %v1765_v27, 0.0 }
 0x1f1   : > { %v1023_v63 = vmax.f32 %v1766_v33, 0.0 }
 0x1f2   : > { %v1044_v1 = vpack.c.bf16 %v1022_v45, %v1020_v42 }
 0x1f3   : > { %v1045_v12 = vpack.c.bf16 %v1023_v63, %v1021_v40 }
 0x1f5   : > { %1223 = vmatprep.mubr.bf16.mxu1 %v1045_v12 }
 0x1f6   : > { %1224 = vmatmul.mubr.bf16.vlgmr.msra.gmra.mrb[20].mxu1 %v1044_v1 }
 0x1f7   : > { %1231 = vmatprep.mubr.bf16.mxu1 %v2741_v58 }
 0x1fe   : > { %1232 = vmatmul.mubr.bf16.gmra.mrb[24].mxu1 %v2736_v38 }
 0x1ff   : > { %1239 = vmatprep.mubr.bf16.mxu1 %v2749_v25 }
 0x206   : > { %1240 = vmatmul.mubr.bf16.gmra.mrb[28].mxu1 %v2746_v21 }
 0x207   : > { %1247 = vmatprep.mubr.bf16.mxu1 %v1051_v0 }
 0x20e   : > { %1248 = vmatmul.mubr.bf16.gmra.mrb[32].mxu1 %v1050_v50 }
 0x20f   : > { %1255 = vmatprep.mubr.bf16.mxu1 %v1053_v10 }
 0x216   : > { %1256 = vmatmul.mubr.bf16.gmra.mrb[36].mxu1 %v1052_v14 }
 0x217   : > { %1263 = vmatprep.mubr.bf16.mxu1 %v1055_v26 }
 0x21e   : > { %1264 = vmatmul.mubr.bf16.gmra.mrb[40].mxu1 %v1054_v22 }
 0x2c9   : > { %v1711_v7 = vpop.f32.mrb[20].mxu1 }
 0x2ca   : > { %v1712_v46 = vpop.f32.mrb[21].mxu1 }
 0x2cb   : > { %v1713_v58 = vadd.f32 %v1712_v46, %v1711_v7  ;;  %v1714_v2 = vpop.f32.mrb[22].mxu1 }
 0x2cc   : > { %v1715_v38 = vpop.f32.mrb[23].mxu1 }
 0x2cd   : > { %v1226_v25 = vadd.f32 %v1713_v58, %v2780_v18  ;;  %v1716_v3 = vadd.f32 %v1715_v38, %v1714_v2 }
 0x2cf   : > { %v1229_v21 = vadd.f32 %v1716_v3, %v2780_v18  ;;  %v2785_v50 = vadd.f32 %v1226_v25, %v2567_v29 }
 0x2d1   : > { %1284 = vadd.xlane.f32.xlu0 %v2785_v50  ;;  %v1717_v0 = vpop.f32.mrb[24].mxu1  ;;  %v2789_v51 = vadd.f32 %v1229_v21, %v2570_v30 }
 0x2d2   : > { %v1718_v6 = vpop.f32.mrb[25].mxu1 }
 0x2d3   : > { %v1719_v47 = vadd.f32 %v1718_v6, %v1717_v0  ;;  %v1720_v48 = vpop.f32.mrb[26].mxu1 }
 0x2d4   : > { %v1721_v52 = vpop.f32.mrb[27].mxu1 }
 0x2d5   : > { %v1234_v54 = vadd.f32 %v1719_v47, %v2780_v18  ;;  %v1722_v11 = vadd.f32 %v1721_v52, %v1720_v48  ;;  %1286 = vadd.xlane.f32.xlu0 %v2789_v51 }
 0x2d7   : > { %v1237_v62 = vadd.f32 %v1722_v11, %v2780_v18  ;;  %v2795_v29 = vadd.f32 %v1234_v54, %v2589_v41 }
 0x2d9   : > { %v1723_v14 = vpop.f32.mrb[28].mxu1  ;;  %1288 = vadd.xlane.f32.xlu1 %v2795_v29  ;;  %v1275_v30 = vadd.f32 %v1237_v62, %v2594_v44 }
 0x2da   : > { %v1724_v15 = vpop.f32.mrb[29].mxu1 }
 0x2db   : > { %v1725_v4 = vadd.f32 %v1724_v15, %v1723_v14  ;;  %v1726_v10 = vpop.f32.mrb[30].mxu1 }
 0x2dc   : > { %v1727_v9 = vpop.f32.mrb[31].mxu1 }
 0x2dd   : > { %v1242_v23 = vadd.f32 %v1725_v4, %v2780_v18  ;;  %v1728_v16 = vadd.f32 %v1727_v9, %v1726_v10  ;;  %1290 = vadd.xlane.f32.xlu1 %v1275_v30 }
 0x2df   : > { %v1245_v19 = vadd.f32 %v1728_v16, %v2780_v18  ;;  %v1276_v13 = vadd.f32 %v1242_v23, %v2584_v37 }
 0x2e1   : > { %v1729_v17 = vpop.f32.mrb[32].mxu1  ;;  %1292 = vadd.xlane.f32.xlu0 %v1276_v13  ;;  %v1277_v41 = vadd.f32 %v1245_v19, %v2613_v56 }
 0x2e2   : > { %v1730_v55 = vpop.f32.mrb[33].mxu1 }
 0x2e3   : > { %v1731_v28 = vadd.f32 %v1730_v55, %v1729_v17  ;;  %v1732_v31 = vpop.f32.mrb[34].mxu1  ;;  %1294 = vadd.xlane.f32.xlu1 %v1277_v41 }
 0x2e4   : > { %v1733_v57 = vpop.f32.mrb[35].mxu1 }
 0x2e5   : > { %v1250_v44 = vadd.f32 %v1731_v28, %v2780_v18  ;;  %v1734_v60 = vadd.f32 %v1733_v57, %v1732_v31 }
 0x2e7   : > { %v1253_v61 = vadd.f32 %v1734_v60, %v2780_v18  ;;  %v1278_v34 = vadd.f32 %v1250_v44, %v2609_v53 }
 0x2e9   : > { %v1735_v20 = vpop.f32.mrb[36].mxu1  ;;  %1296 = vadd.xlane.f32.xlu0 %v1278_v34  ;;  %v1279_v37 = vadd.f32 %v1253_v61, %v2633_v8 }
 0x2ea   : > { %v1736_v22 = vpop.f32.mrb[37].mxu1 }
 0x2eb   : > { %v1737_v36 = vadd.f32 %v1736_v22, %v1735_v20  ;;  %v1738_v24 = vpop.f32.mrb[38].mxu1  ;;  %1298 = vadd.xlane.f32.xlu1 %v1279_v37 }
 0x2ec   : > { %v1739_v56 = vpop.f32.mrb[39].mxu1 }
 0x2ed   : > { %v1258_v26 = vadd.f32 %v1737_v36, %v2780_v18  ;;  %v1740_v49 = vadd.f32 %v1739_v56, %v1738_v24 }
 0x2ef   : > { %v1261_v43 = vadd.f32 %v1740_v49, %v2780_v18  ;;  %v1280_v27 = vadd.f32 %v1258_v26, %v2630_v5 }
 0x2f1   : > { %v1741_v32 = vpop.f32.mrb[40].mxu1  ;;  %1300 = vadd.xlane.f32.xlu0 %v1280_v27  ;;  %v1281_v53 = vadd.f32 %v1261_v43, %v2649_v39 }
 0x2f2   : > { %v1742_v33 = vpop.f32.mrb[41].mxu1 }
 0x2f3   : > { %v1743_v42 = vadd.f32 %v1742_v33, %v1741_v32  ;;  %v1744_v45 = vpop.f32.mrb[42].mxu1  ;;  %1302 = vadd.xlane.f32.xlu1 %v1281_v53 }
 0x2f4   : > { %v1745_v8 = vpop.f32.mrb[43].mxu1 }
 0x2f5   : > { %v1266_v40 = vadd.f32 %v1743_v42, %v2780_v18  ;;  %v1746_v63 = vadd.f32 %v1745_v8, %v1744_v45 }
 0x2f7   : > { %v1269_v1 = vadd.f32 %v1746_v63, %v2780_v18  ;;  %v1282_v12 = vadd.f32 %v1266_v40, %v2646_v35  ;;  %v2869_v63 = vld [vmem:[%s2990_s6] ss:$0 sm:$0xff] }
 0x2f9   : > { %1304 = vadd.xlane.f32.xlu0 %v1282_v12  ;;  %v1283_v7 = vadd.f32 %v1269_v1, %v2666_v59 }
 0x2fb   : > { %1306 = vadd.xlane.f32.xlu1 %v1283_v7 }
 0x35e   : > { %v1285_v5 = vpop.xlane.xlu0 %1284 }
 0x35f   : > { %v1308_v46 = vmul.f32 0.0078125, %v1285_v5  ;;  %v2875_v5 = vld [vmem:[%s2991_s7] ss:$0 sm:$0xff] }
 0x361   : > { %v2816_v39 = vsub.f32 %v2785_v50, %v1308_v46 }
 0x362   : > { %v1287_v58 = vpop.xlane.xlu0 %1286 }
 0x363   : > { %v1309_v2 = vmul.f32 0.0078125, %v1287_v58  ;;  %v1332_v38 = vmul.f32 %v2816_v39, %v2816_v39 }
 0x365   : > { %v2821_v25 = vsub.f32 %v2789_v51, %v1309_v2  ;;  %1344 = vadd.xlane.f32.xlu0 %v1332_v38 }
 0x366   : > { %v1289_v18 = vpop.xlane.xlu1 %1288 }
 0x367   : > { %v1310_v35 = vmul.f32 0.0078125, %v1289_v18  ;;  %v1333_v59 = vmul.f32 %v2821_v25, %v2821_v25 }
 0x369   : > { %v2826_v3 = vsub.f32 %v2795_v29, %v1310_v35  ;;  %1346 = vadd.xlane.f32.xlu1 %v1333_v59 }
 0x36a   : > { %v1291_v21 = vpop.xlane.xlu1 %1290 }
 0x36b   : > { %v1311_v50 = vmul.f32 0.0078125, %v1291_v21  ;;  %v1334_v0 = vmul.f32 %v2826_v3, %v2826_v3 }
 0x36d   : > { %v2830_v6 = vsub.f32 %v1275_v30, %v1311_v50  ;;  %1348 = vadd.xlane.f32.xlu0 %v1334_v0 }
 0x36e   : > { %v1293_v47 = vpop.xlane.xlu0 %1292 }
 0x36f   : > { %v1312_v48 = vmul.f32 0.0078125, %v1293_v47  ;;  %v1335_v51 = vmul.f32 %v2830_v6, %v2830_v6 }
 0x370   : > { %v1295_v52 = vpop.xlane.xlu1 %1294 }
 0x371   : > { %v2834_v54 = vsub.f32 %v1276_v13, %v1312_v48  ;;  %v1313_v11 = vmul.f32 0.0078125, %v1295_v52  ;;  %1350 = vadd.xlane.f32.xlu1 %v1335_v51 }
 0x373   : > { %v2836_v62 = vsub.f32 %v1277_v41, %v1313_v11  ;;  %v1336_v29 = vmul.f32 %v2834_v54, %v2834_v54 }
 0x375   : > { %1352 = vadd.xlane.f32.xlu0 %v1336_v29  ;;  %v1337_v14 = vmul.f32 %v2836_v62, %v2836_v62 }
 0x376   : > { %v1297_v15 = vpop.xlane.xlu0 %1296 }
 0x377   : > { %v1314_v4 = vmul.f32 0.0078125, %v1297_v15  ;;  %1354 = vadd.xlane.f32.xlu1 %v1337_v14 }
 0x378   : > { %v1299_v10 = vpop.xlane.xlu1 %1298 }
 0x379   : > { %v2842_v30 = vsub.f32 %v1278_v34, %v1314_v4  ;;  %v1315_v9 = vmul.f32 0.0078125, %v1299_v10 }
 0x37b   : > { %v2844_v23 = vsub.f32 %v1279_v37, %v1315_v9  ;;  %v1338_v16 = vmul.f32 %v2842_v30, %v2842_v30 }
 0x37d   : > { %1356 = vadd.xlane.f32.xlu0 %v1338_v16  ;;  %v1339_v19 = vmul.f32 %v2844_v23, %v2844_v23 }
 0x37e   : > { %v1301_v13 = vpop.xlane.xlu0 %1300 }
 0x37f   : > { %v1316_v17 = vmul.f32 0.0078125, %v1301_v13  ;;  %1358 = vadd.xlane.f32.xlu1 %v1339_v19 }
 0x380   : > { %v1303_v41 = vpop.xlane.xlu1 %1302 }
 0x381   : > { %v2850_v55 = vsub.f32 %v1280_v27, %v1316_v17  ;;  %v1317_v28 = vmul.f32 0.0078125, %v1303_v41 }
 0x383   : > { %v2852_v31 = vsub.f32 %v1281_v53, %v1317_v28  ;;  %v1340_v57 = vmul.f32 %v2850_v55, %v2850_v55 }
 0x385   : > { %1360 = vadd.xlane.f32.xlu0 %v1340_v57  ;;  %v1341_v44 = vmul.f32 %v2852_v31, %v2852_v31 }
 0x386   : > { %v1305_v60 = vpop.xlane.xlu0 %1304 }
 0x387   : > { %v1318_v61 = vmul.f32 0.0078125, %v1305_v60  ;;  %1362 = vadd.xlane.f32.xlu1 %v1341_v44 }
 0x388   : > { %v1307_v34 = vpop.xlane.xlu1 %1306 }
 0x389   : > { %v2858_v20 = vsub.f32 %v1282_v12, %v1318_v61  ;;  %v1319_v37 = vmul.f32 0.0078125, %v1307_v34 }
 0x38b   : > { %v2860_v22 = vsub.f32 %v1283_v7, %v1319_v37  ;;  %v1342_v36 = vmul.f32 %v2858_v20, %v2858_v20 }
 0x38d   : > { %1364 = vadd.xlane.f32.xlu0 %v1342_v36  ;;  %v1343_v24 = vmul.f32 %v2860_v22, %v2860_v22 }
 0x38f   : > { %1366 = vadd.xlane.f32.xlu1 %v1343_v24 }
 0x3f2   : > { %v1345_v56 = vpop.xlane.xlu0 %1344 }
 0x3f3   : > { %v1368_v26 = vmul.f32 0.0078125, %v1345_v56 }
 0x3f5   : > { %v1380_v49 = vadd.f32 1e-05, %v1368_v26 }
 0x3f6   : > { %v1347_v43 = vpop.xlane.xlu1 %1346 }
 0x3f7   : > { %1998 = vrsqrt.f32 %v1380_v49  ;;  %v1369_v27 = vmul.f32 0.0078125, %v1347_v43 }
 0x3f9   : > { %v1381_v32 = vadd.f32 1e-05, %v1369_v27 }
 0x3fa   : > { %v1349_v53 = vpop.xlane.xlu0 %1348 }
 0x3fb   : > { %2000 = vrsqrt.f32 %v1381_v32  ;;  %v1370_v33 = vmul.f32 0.0078125, %v1349_v53 }
 0x3fd   : > { %v1382_v42 = vadd.f32 1e-05, %v1370_v33 }
 0x3fe   : > { %v1351_v45 = vpop.xlane.xlu1 %1350 }
 0x3ff   : > { %2002 = vrsqrt.f32 %v1382_v42  ;;  %v1371_v8 = vmul.f32 0.0078125, %v1351_v45 }
 0x401   : > { %v1999_v40 = vpop.eup %1998  ;;  %v1383_v1 = vadd.f32 1e-05, %v1371_v8 }
 0x402   : > { %v1404_v12 = vmul.f32 %v1999_v40, %v2816_v39  ;;  %v1353_v7 = vpop.xlane.xlu0 %1352 }
 0x403   : > { %2004 = vrsqrt.f32 %v1383_v1  ;;  %v1372_v46 = vmul.f32 0.0078125, %v1353_v7 }
 0x404   : > { %v1423_v58 = vmul.f32 %v2869_v63, %v1404_v12  ;;  %v1355_v2 = vpop.xlane.xlu1 %1354 }
 0x405   : > { %v2001_v38 = vpop.eup %2000  ;;  %v1384_v18 = vadd.f32 1e-05, %v1372_v46  ;;  %v1373_v35 = vmul.f32 0.0078125, %v1355_v2 }
 0x406   : > { %v1442_v59 = vadd.f32 %v2875_v5, %v1423_v58  ;;  %v1405_v21 = vmul.f32 %v2001_v38, %v2821_v25 }
 0x407   : > { %2006 = vrsqrt.f32 %v1384_v18  ;;  %v1385_v39 = vadd.f32 1e-05, %v1373_v35 }
 0x408   : > { %1454 = vst [vmem:[%s2882_s4] sm:$0xff] %v1442_v59  ;;  %v1424_v50 = vmul.f32 %v2869_v63, %v1405_v21 }
 0x409   : > { %v2003_v0 = vpop.eup %2002  ;;  %2008 = vrsqrt.f32 %v1385_v39 }
 0x40a   : > { %v1443_v47 = vadd.f32 %v2875_v5, %v1424_v50  ;;  %v1406_v48 = vmul.f32 %v2003_v0, %v2826_v3  ;;  %v1357_v51 = vpop.xlane.xlu0 %1356 }
 0x40b   : > { %v1374_v52 = vmul.f32 0.0078125, %v1357_v51 }
 0x40c   : > { %1455 = vst [vmem:[%s2882_s4 + $0x8] sm:$0xff] %v1443_v47  ;;  %v1425_v25 = vmul.f32 %v2869_v63, %v1406_v48  ;;  %v1359_v11 = vpop.xlane.xlu1 %1358 }
 0x40d   : > { %v2005_v29 = vpop.eup %2004  ;;  %v1386_v14 = vadd.f32 1e-05, %v1374_v52  ;;  %v1375_v15 = vmul.f32 0.0078125, %v1359_v11 }
 0x40e   : > { %v1444_v4 = vadd.f32 %v2875_v5, %v1425_v25  ;;  %v1407_v10 = vmul.f32 %v2005_v29, %v2830_v6 }
 0x40f   : > { %2010 = vrsqrt.f32 %v1386_v14  ;;  %v1387_v9 = vadd.f32 1e-05, %v1375_v15 }
 0x410   : > { %1456 = vst [vmem:[%s2882_s4 + $0x10] sm:$0xff] %v1444_v4  ;;  %v1426_v16 = vmul.f32 %v2869_v63, %v1407_v10 }
 0x411   : > { %v2007_v3 = vpop.eup %2006  ;;  %2012 = vrsqrt.f32 %v1387_v9 }
 0x412   : > { %v1445_v19 = vadd.f32 %v2875_v5, %v1426_v16  ;;  %v1408_v13 = vmul.f32 %v2007_v3, %v2834_v54  ;;  %v1361_v17 = vpop.xlane.xlu0 %1360 }
 0x413   : > { %v2009_v41 = vpop.eup %2008  ;;  %v1376_v28 = vmul.f32 0.0078125, %v1361_v17 }
 0x414   : > { %1457 = vst [vmem:[%s2882_s4 + $0x18] sm:$0xff] %v1445_v19  ;;  %v1427_v57 = vmul.f32 %v2869_v63, %v1408_v13  ;;  %v1409_v6 = vmul.f32 %v2009_v41, %v2836_v62  ;;  %v1363_v44 = vpop.xlane.xlu1 %1362 }
 0x415   : > { %v1388_v60 = vadd.f32 1e-05, %v1376_v28  ;;  %v1377_v61 = vmul.f32 0.0078125, %v1363_v44 }
 0x416   : > { %v1446_v34 = vadd.f32 %v2875_v5, %v1427_v57  ;;  %v1428_v37 = vmul.f32 %v2869_v63, %v1409_v6 }
 0x417   : > { %2014 = vrsqrt.f32 %v1388_v60  ;;  %v1389_v36 = vadd.f32 1e-05, %v1377_v61 }
 0x418   : > { %1458 = vst [vmem:[%s2882_s4 + $0x20] sm:$0xff] %v1446_v34  ;;  %v1447_v54 = vadd.f32 %v2875_v5, %v1428_v37 }
 0x419   : > { %v2011_v24 = vpop.eup %2010  ;;  %2016 = vrsqrt.f32 %v1389_v36 }
 0x41a   : > { %1459 = vst [vmem:[%s2882_s4 + $0x28] sm:$0xff] %v1447_v54  ;;  %v1410_v56 = vmul.f32 %v2011_v24, %v2842_v30  ;;  %v1365_v26 = vpop.xlane.xlu0 %1364 }
 0x41b   : > { %v2013_v62 = vpop.eup %2012  ;;  %v1378_v49 = vmul.f32 0.0078125, %v1365_v26 }
 0x41c   : > { %v1429_v43 = vmul.f32 %v2869_v63, %v1410_v56  ;;  %v1411_v27 = vmul.f32 %v2013_v62, %v2844_v23  ;;  %v1367_v32 = vpop.xlane.xlu1 %1366 }
 0x41d   : > { %v1390_v53 = vadd.f32 1e-05, %v1378_v49  ;;  %v1379_v33 = vmul.f32 0.0078125, %v1367_v32 }
 0x41e   : > { %v1448_v42 = vadd.f32 %v2875_v5, %v1429_v43  ;;  %v1430_v45 = vmul.f32 %v2869_v63, %v1411_v27 }
 0x41f   : > { %2018 = vrsqrt.f32 %v1390_v53  ;;  %v1391_v8 = vadd.f32 1e-05, %v1379_v33 }
 0x420   : > { %1460 = vst [vmem:[%s2882_s4 + $0x30] sm:$0xff] %v1448_v42  ;;  %v1449_v30 = vadd.f32 %v2875_v5, %v1430_v45 }
 0x421   : > { %v2015_v40 = vpop.eup %2014  ;;  %2020 = vrsqrt.f32 %v1391_v8 }
 0x422   : > { %1461 = vst [vmem:[%s2882_s4 + $0x38] sm:$0xff] %v1449_v30  ;;  %v1412_v23 = vmul.f32 %v2015_v40, %v2850_v55 }
 0x423   : > { %v2017_v1 = vpop.eup %2016 }
 0x424   : > { %v1431_v12 = vmul.f32 %v2869_v63, %v1412_v23  ;;  %v1413_v7 = vmul.f32 %v2017_v1, %v2852_v31 }
 0x426   : > { %v1450_v46 = vadd.f32 %v2875_v5, %v1431_v12  ;;  %v1432_v58 = vmul.f32 %v2869_v63, %v1413_v7 }
 0x428   : > { %1462 = vst [vmem:[%s2882_s4 + $0x40] sm:$0xff] %v1450_v46  ;;  %v1451_v2 = vadd.f32 %v2875_v5, %v1432_v58 }
 0x429   : > { %v2019_v38 = vpop.eup %2018 }
 0x42a   : > { %1463 = vst [vmem:[%s2882_s4 + $0x48] sm:$0xff] %v1451_v2  ;;  %v1414_v18 = vmul.f32 %v2019_v38, %v2858_v20 }
 0x42b   : > { %v2021_v55 = vpop.eup %2020 }
 0x42c   : > { %v1433_v35 = vmul.f32 %v2869_v63, %v1414_v18  ;;  %v1415_v31 = vmul.f32 %v2021_v55, %v2860_v22 }
 0x42e   : > { %v1452_v59 = vadd.f32 %v2875_v5, %v1433_v35  ;;  %v1434_v21 = vmul.f32 %v2869_v63, %v1415_v31 }
 0x430   : > { %1464 = vst [vmem:[%s2882_s4 + $0x50] sm:$0xff] %v1452_v59  ;;  %v1453_v20 = vadd.f32 %v2875_v5, %v1434_v21 }
 0x432   : > { %1465 = vst [vmem:[%s2882_s4 + $0x58] sm:$0xff] %v1453_v20 }
 0x433   : > { %2151 = shalt.err (!%p2148_p7)
}
 0x434   : > { %s2152_s17 = scalar_lea.hbm %s2930_s23, 1536  ;;  %s2156_s27 = scalar_lea.hbm %s2992_s8, 3072 }
 0x435   : > { %p2153_p13 = scmp.ne.s32.totalorder %s2930_s23, %s2152_s17  ;;  %p2157_p1 = scmp.lt.u32.totalorder %s2930_s23, %s2992_s8 }
 0x436   : > { %p2158_p11 = scmp.lt.u32.totalorder %s2156_s27, %s2152_s17  ;;  %p2160_p2 = scmp.lt.u32.totalorder %s2152_s17, %s2930_s23 }
 0x437   : > { %p2154_p8 = pnand %p2153_p13, %p3029_p6 }
 0x438   : > { %p2159_p0 = por %p2158_p11, %p2157_p1 }
 0x439   : > { %p2155_p12 = pneg %p2154_p8 }
 0x43a   : > { %p2161_p10 = por %p2160_p2, %p2159_p0 }
 0x43c   : > { %p2162_p3 = pnand %p2161_p10, %p2155_p12 }
 0x43e   : > { %2165 = shalt.err (!%p2162_p3)
}
 0x43f   : > { %s2244_s22 = smov 128   ;;  %s2245_s18 = smov 8  }
 0x440   : > { %1827 = dma.vmem_to_hbm [thread:$0]  (%p3029_p6), %s2932_s19, 1536, %s2930_s23, %s1467_s30, %s2244_s22, %s2244_s22, %s2245_s18  }
 0x441 PF: > { %s3030_s0 = sld [smem:[#allocation16_spill]]  ;;  %s3031_s4 = sld [smem:[#allocation18_spill]] }
 0x442   : > { %p3033_p9 = scmp.ge.s32.totalorder %s2232_s10, 2 }
 0x447   : > { %s1497_s2 = sand.u32 1, %s3030_s0   ;;  %p3032_p4 = scmp.ne.s32.totalorder %s3031_s4, 0 }
 0x448   : > { %s1498_s14 = scalar_lea.sflag [#allocation4], %s1497_s2 }
 0x449   : > { %p1844_p5 = pnand %p3033_p9, %p3032_p4 }
 0x44b   : > { %2207 = dma.done.wait (!%p1844_p5), %s1498_s14, 1536  }
 0x44c   : > { %2209 = vsyncadd (!%p1844_p5), %s1498_s14, 4294965760  ;;  %s28_s10 = sadd.s32 1, %s2232_s10   ;;  %s3034_s25 = sld [smem:[#allocation17_spill]] }
 0x44d   : > { %p25_p7 = scmp.ge.s32.totalorder %s28_s10, 4   ;;  %s3035_s29 = sld [smem:[#allocation20_spill]] }
 0x44e   : > { %s3036_s26 = sld [smem:[#allocation19_spill]]  ;;  %s3037_s27 = smov %s2216_s28 }
 0x44f   : > { %s3039_s30 = smov %s2228_s9  ;;  %27 = sbr.rel (!%p25_p7) target bundleno = 13 (0xd), region = 118 }
 0x452   : > { %s3038_s28 = smov %s3034_s25 }
 0x454   : > { %s3040_s9 = smov %s3036_s26 }
 0x456   :  { %1503 = vsyncpa [#allocation3], 1 }
 0x457   :  { %1505 = vsyncpa [#allocation3 + $0x1], 1 }
 0x458   :  { %1506 = vsyncpa [#allocation6], 1 }
 0x459   :  { %1508 = vsyncpa [#allocation6 + $0x1], 1 }
 0x45a   :  { %1509 = vsyncpa [#allocation9], 1 }
 0x45b   :  { %1510 = vsyncpa [#allocation4], 1 }
 0x45c   :  { %1512 = vsyncpa [#allocation4 + $0x1], 1 }

</bundles_post_ra>
